<compile_context>
chip_gen: v7x
topology: tpu7x:2x2x1
jax: 0.10.0
libtpu: 0.0.40
codegen_flags: <defaults>
</compile_context>

<pallas_src>
import functools

import jax
import jax.numpy as jnp
from jax.experimental import pallas as pl
from jax.experimental.pallas import tpu as pltpu


# ----------------------------------------------------------------------------
# Fused relational-graph encoder.
#   Per grid step (one block of Gb graphs packed block-diagonally):
#     for each layer:  msgs = H @ [W_self | W_1 | ... | W_R]
#                      out  = relu(msgs_self + sum_r A_bd_r @ msgs_r + b)
#   optional mean readout fused as a pooling matmul  P @ H  (P rows = 1/N).
# ----------------------------------------------------------------------------
def _rgn_encoder_kernel(a_ref, h_ref, *rest, num_rel, num_layers, do_readout):
    w_refs = rest[:2 * num_layers]
    if do_readout:
        pool_ref = rest[2 * num_layers]
        out_ref = rest[2 * num_layers + 1]
    else:
        out_ref = rest[2 * num_layers]

    h = h_ref[0]                                          # [Gb*N, D_in]
    for l in range(num_layers):                           # static unroll
        w_cat = w_refs[2 * l][...]                        # [D_l, (R+1)*M]
        bias = w_refs[2 * l + 1][...]                     # [1, M]
        m = bias.shape[-1]
        msgs = jnp.dot(h, w_cat, preferred_element_type=jnp.float32)
        acc = msgs[:, :m] + bias                          # self term + bias
        for r in range(num_rel):                          # static unroll
            acc = acc + jnp.dot(a_ref[0, r],
                                msgs[:, (r + 1) * m:(r + 2) * m],
                                preferred_element_type=jnp.float32)
        h = jax.nn.relu(acc)                              # [Gb*N, M]

    if do_readout:
        # per-graph mean readout as one MXU matmul: [Gb, Gb*N] @ [Gb*N, M]
        out_ref[0] = jnp.dot(pool_ref[...], h, preferred_element_type=jnp.float32)
    else:
        out_ref[0] = h


def rgn_encode(adj_bd, feat, layers, pool=None):
    """adj_bd: [nb, R, Gb*N, Gb*N] block-diag, feat: [nb, Gb*N, D_in]."""
    nb, R, GN, _ = adj_bd.shape
    D_in = feat.shape[-1]
    M = layers[-1][1].shape[-1]
    num_layers = len(layers)

    in_specs = [
        pl.BlockSpec((1, R, GN, GN), lambda b: (b, 0, 0, 0)),
        pl.BlockSpec((1, GN, D_in), lambda b: (b, 0, 0)),
    ]
    args = [adj_bd, feat]
    for (w_cat, bias) in layers:
        in_specs.append(pl.BlockSpec(w_cat.shape, lambda b: (0, 0)))
        in_specs.append(pl.BlockSpec(bias.shape, lambda b: (0, 0)))
        args += [w_cat, bias]

    do_readout = pool is not None
    if do_readout:
        gb = pool.shape[0]
        in_specs.append(pl.BlockSpec(pool.shape, lambda b: (0, 0)))
        args.append(pool)
        out_shape = jax.ShapeDtypeStruct((nb, gb, M), jnp.float32)
        out_spec = pl.BlockSpec((1, gb, M), lambda b: (b, 0, 0))
    else:
        out_shape = jax.ShapeDtypeStruct((nb, GN, M), jnp.float32)
        out_spec = pl.BlockSpec((1, GN, M), lambda b: (b, 0, 0))

    kernel = functools.partial(_rgn_encoder_kernel, num_rel=R,
                               num_layers=num_layers, do_readout=do_readout)
    return pl.pallas_call(
        kernel,
        out_shape=out_shape,
        grid=(nb,),
        in_specs=in_specs,
        out_specs=out_spec,
        compiler_params=pltpu.CompilerParams(dimension_semantics=("parallel",)),
    )(*args)


# ----------------------------------------------------------------------------
# GRU over the whole sequence in one kernel invocation (PyTorch nn.GRU cell
# equations, gate order r, z, n). Only the final hidden state is emitted
# (the module only consumes h_enc_out[:, -1, :]). Gates computed with one
# input-side and one hidden-side matmul against concatenated [D, 3H] weights.
# ----------------------------------------------------------------------------
def _gru_seq_kernel(x_ref, wih_ref, whh_ref, bih_ref, bhh_ref, o_ref,
                    *, seq_len, hidden):
    wih = wih_ref[...]                                    # [Din, 3H]
    whh = whh_ref[...]                                    # [H, 3H]
    bih = bih_ref[...]                                    # [1, 3H]
    bhh = bhh_ref[...]                                    # [1, 3H]
    B = o_ref.shape[0]
    H = hidden

    def step(t, h):
        x = x_ref[t]                                      # [B, Din]
        gi = jnp.dot(x, wih, preferred_element_type=jnp.float32) + bih
        gh = jnp.dot(h, whh, preferred_element_type=jnp.float32) + bhh
        r = jax.nn.sigmoid(gi[:, :H] + gh[:, :H])
        z = jax.nn.sigmoid(gi[:, H:2 * H] + gh[:, H:2 * H])
        n = jnp.tanh(gi[:, 2 * H:] + r * gh[:, 2 * H:])
        return (1.0 - z) * n + z * h

    h0 = jnp.zeros((B, H), jnp.float32)
    h_last = jax.lax.fori_loop(0, seq_len, step, h0, unroll=True)
    o_ref[...] = h_last


def gru_last(x_seq, wih_cat, whh_cat, bih_cat, bhh_cat):
    T, B, Din = x_seq.shape
    H = whh_cat.shape[0]
    kernel = functools.partial(_gru_seq_kernel, seq_len=T, hidden=H)
    return pl.pallas_call(
        kernel,
        out_shape=jax.ShapeDtypeStruct((B, H), jnp.float32),
        grid=(1,),
        in_specs=[
            pl.BlockSpec((T, B, Din), lambda i: (0, 0, 0)),
            pl.BlockSpec((Din, 3 * H), lambda i: (0, 0)),
            pl.BlockSpec((H, 3 * H), lambda i: (0, 0)),
            pl.BlockSpec((1, 3 * H), lambda i: (0, 0)),
            pl.BlockSpec((1, 3 * H), lambda i: (0, 0)),
        ],
        out_specs=pl.BlockSpec((B, H), lambda i: (0, 0)),
        compiler_params=pltpu.CompilerParams(dimension_semantics=("arbitrary",)),
    )(x_seq, wih_cat, whh_cat, bih_cat, bhh_cat)


# ----------------------------------------------------------------------------
# Wrapper-side weight / graph packing helpers (run once under jit, cheap).
# ----------------------------------------------------------------------------
def _cat_rel_weights(w_self, w_rel):
    """[D, M], [R, D, M] -> [D, (R+1)*M]; column block 0 = self, block r+1 = W_r."""
    w_all = jnp.concatenate([w_self[None], w_rel], axis=0)      # [R+1, D, M]
    r1, d, m = w_all.shape
    return jnp.transpose(w_all, (1, 0, 2)).reshape(d, r1 * m)


def _block_diag_adj(adj, gb):
    """[G, R, N, N] -> [G//gb, R, gb*N, gb*N] block-diagonal per relation."""
    G, R, N, _ = adj.shape
    nb = G // gb
    a = adj.reshape(nb, gb, R, N, N)
    eye = jnp.eye(gb, dtype=adj.dtype)
    bd = jnp.einsum('bgrpq,gh->brgphq', a, eye)
    return bd.reshape(nb, R, gb * N, gb * N)


# ----------------------------------------------------------------------------
# Full forward (mirrors MultiStepInputGraphNetwork.forward)
# ----------------------------------------------------------------------------
def multi_step_forward(params, num_time_steps, hist_adj, hist_feat,
                       curr_adj, curr_feat, curr_num_nodes):
    B, T, R, N, _ = hist_adj.shape
    assert T == num_time_steps
    G = B * T

    hist_layers = [(_cat_rel_weights(ws, wr), b) for (ws, wr, b) in params["hist_rgn"]]
    curr_layers = [(_cat_rel_weights(ws, wr), b) for (ws, wr, b) in params["curr_rgn"]]

    # ---- hist_encoder: fused RGN layers + mean readout ----------------------
    nb = 2 if G % 2 == 0 else 1              # keep a parallel grid axis >= 2
    gb = G // nb
    adj_bd = _block_diag_adj(hist_adj.reshape(G, R, N, N), gb)
    feat = hist_feat.reshape(nb, gb * N, hist_feat.shape[-1])
    pool = jnp.kron(jnp.eye(gb, dtype=jnp.float32),
                    jnp.full((1, N), 1.0 / N, jnp.float32))      # [gb, gb*N]
    # TODO(synk): mean readout assumes all N node slots are real nodes (dense
    #             graphs); DGL mean_nodes over padded graphs would need masks.
    readout = rgn_encode(adj_bd, feat, hist_layers, pool=pool)   # [nb, gb, M]
    m_hist = readout.shape[-1]
    readout = readout.reshape(B, T, m_hist)

    # ---- GRU over time (single fused kernel, last hidden only) --------------
    # NOTE: weights stored as [gate, in, out] with gate order (r, z, n) and
    # right-multiplication; a PyTorch nn.GRU checkpoint would need a transpose.
    wih, whh, bih, bhh = params["gru"]
    H = whh.shape[-1]
    wih_cat = jnp.transpose(wih, (1, 0, 2)).reshape(wih.shape[1], 3 * H)
    whh_cat = jnp.transpose(whh, (1, 0, 2)).reshape(H, 3 * H)
    bih_cat = bih.reshape(1, 3 * H)
    bhh_cat = bhh.reshape(1, 3 * H)
    x_seq = jnp.transpose(readout, (1, 0, 2))                    # [T, B, M]
    recent_h_enc = gru_last(x_seq, wih_cat, whh_cat, bih_cat, bhh_cat)  # [B, H]

    # ---- curr_encoder: fused RGN layers, node outputs -----------------------
    NC = curr_adj.shape[-1]
    adj_c = curr_adj.reshape(B, R, NC, NC)          # one graph per grid step
    feat_c = curr_feat.reshape(B, NC, curr_feat.shape[-1])
    c_nodes = rgn_encode(adj_c, feat_c, curr_layers, pool=None)  # [B, NC, M]
    c_enc_out = c_nodes.reshape(B * NC, -1)

    # ---- repeat_interleave + concat (plain jnp glue; XLA fuses it) ----------
    # TODO(synk): heterogeneous batch_num_nodes would need a segment gather.
    rep_h = jnp.repeat(recent_h_enc, int(curr_num_nodes[0]), axis=0)
    return jnp.concatenate([rep_h, c_enc_out], axis=-1)


# ----------------------------------------------------------------------------
# Deterministic parameter init (same structure as before)
# ----------------------------------------------------------------------------
def _glorot(key, shape):
    fan_in, fan_out = shape[-2], shape[-1]
    lim = (6.0 / (fan_in + fan_out)) ** 0.5
    return jax.random.uniform(key, shape, jnp.float32, -lim, lim)


def init_params(key, *, d_in, model_dim, num_rel, num_layers, hidden_size):
    keys = jax.random.split(key, 4 * num_layers * 2 + 4)
    ki = iter(range(len(keys)))

    def make_rgn():
        layers = []
        d = d_in
        for _ in range(num_layers):
            w_self = _glorot(keys[next(ki)], (d, model_dim))
            w_rel = _glorot(keys[next(ki)], (num_rel, d, model_dim))
            bias = jnp.zeros((1, model_dim), jnp.float32)
            layers.append((w_self, w_rel, bias))
            d = model_dim
        return layers

    hist_rgn = make_rgn()
    curr_rgn = make_rgn()

    wih = _glorot(keys[next(ki)], (3, model_dim, hidden_size))
    whh = _glorot(keys[next(ki)], (3, hidden_size, hidden_size))
    bih = jnp.zeros((3, 1, hidden_size), jnp.float32)
    bhh = jnp.zeros((3, 1, hidden_size), jnp.float32)

    return {"hist_rgn": hist_rgn, "curr_rgn": curr_rgn, "gru": (wih, whh, bih, bhh)}


# ----------------------------------------------------------------------------
# Pure-jnp reference of the same forward (for a correctness check)
# ----------------------------------------------------------------------------
def _reference_forward(params, hist_adj, hist_feat, curr_adj, curr_feat, nc):
    B, T, R, N, _ = hist_adj.shape

    def rgn(adj, h, layers):
        for (w_self, w_rel, bias) in layers:
            msg_self = jnp.einsum('gnd,dm->gnm', h, w_self)
            msg_rel = jnp.einsum('gnd,rdm->grnm', h, w_rel)
            agg = jnp.einsum('grnk,grkm->gnm', adj, msg_rel)
            h = jax.nn.relu(msg_self + agg + bias)
        return h

    a = hist_adj.reshape(B * T, R, N, N)
    hf = hist_feat.reshape(B * T, N, -1)
    ro = rgn(a, hf, params["hist_rgn"]).mean(axis=1).reshape(B, T, -1)

    wih, whh, bih, bhh = params["gru"]
    H = whh.shape[-1]
    h = jnp.zeros((B, H), jnp.float32)
    for t in range(T):
        x = ro[:, t]
        gi = [x @ wih[k] + bih[k] for k in range(3)]
        gh = [h @ whh[k] + bhh[k] for k in range(3)]
        r = jax.nn.sigmoid(gi[0] + gh[0])
        z = jax.nn.sigmoid(gi[1] + gh[1])
        n = jnp.tanh(gi[2] + r * gh[2])
        h = (1.0 - z) * n + z * h

    cn = rgn(curr_adj, curr_feat, params["curr_rgn"])
    c = cn.reshape(B * curr_adj.shape[-1], -1)
    rep = jnp.repeat(h, nc, axis=0)
    return jnp.concatenate([rep, c], axis=-1)


if __name__ == "__main__":
    # Small, module-consistent shapes.
    B, T = 2, 4          # batch of episodes, history time steps
    R = 3                # number of edge relation types
    N = 8                # nodes per history graph
    NC = 8               # nodes per current graph (per batch element)
    D_IN = 8             # raw node feature dim
    MODEL_DIM = 16       # RGN model_dim (hist and curr)
    HIDDEN = 16          # GRU hidden_size
    OUT_DIM = MODEL_DIM + HIDDEN   # out_dim = curr model_dim + rnn hidden_size

    root = jax.random.PRNGKey(0)
    k_p, k_ha, k_hf, k_ca, k_cf = jax.random.split(root, 5)

    params = init_params(k_p, d_in=D_IN, model_dim=MODEL_DIM, num_rel=R,
                         num_layers=2, hidden_size=HIDDEN)

    hist_adj = jax.random.bernoulli(k_ha, 0.3, (B, T, R, N, N)).astype(jnp.float32)
    hist_feat = jax.random.normal(k_hf, (B, T, N, D_IN), jnp.float32)
    curr_adj = jax.random.bernoulli(k_ca, 0.3, (B, R, NC, NC)).astype(jnp.float32)
    curr_feat = jax.random.normal(k_cf, (B, NC, D_IN), jnp.float32)
    curr_num_nodes = [NC] * B   # batch_num_nodes of BatchedDGLGraph (all equal)

    fwd = jax.jit(lambda p, ha, hf, ca, cf: multi_step_forward(
        p, T, ha, hf, ca, cf, curr_num_nodes))
    out = jax.block_until_ready(fwd(params, hist_adj, hist_feat, curr_adj, curr_feat))

    assert out.shape == (B * NC, OUT_DIM), out.shape
    assert jnp.all(jnp.isfinite(out))

    ref = _reference_forward(params, hist_adj, hist_feat, curr_adj, curr_feat, NC)
    assert jnp.allclose(out, ref, atol=1e-4, rtol=1e-4), float(jnp.max(jnp.abs(out - ref)))

    print("KERNEL_OK")
</pallas_src>

<mosaic_0001>
module attributes {stable_mosaic.version = 11 : i64} {
  func.func @_rgn_encoder_kernel(%arg0: i32, %arg1: memref<1x3x32x32xf32, #tpu.memory_space<vmem>>, %arg2: memref<1x32x8xf32, #tpu.memory_space<vmem>>, %arg3: memref<8x64xf32, #tpu.memory_space<vmem>>, %arg4: memref<1x16xf32, #tpu.memory_space<vmem>>, %arg5: memref<16x64xf32, #tpu.memory_space<vmem>>, %arg6: memref<1x16xf32, #tpu.memory_space<vmem>>, %arg7: memref<4x32xf32, #tpu.memory_space<vmem>>, %arg8: memref<1x4x16xf32, #tpu.memory_space<vmem>>) attributes {dimension_semantics = [#tpu.dimension_semantics<parallel>], iteration_bounds = array<i64: 2>, scalar_prefetch = 0 : i64, scratch_operands = 0 : i64, tpu.core_type = #tpu.core_type<tc>, window_params = [{transform_indices = @transform_0, window_bounds = array<i64: 1, 3, 32, 32>}, {transform_indices = @transform_1, window_bounds = array<i64: 1, 32, 8>}, {pipeline_mode = #tpu.pipeline_mode<synchronous>, transform_indices = @transform_2, window_bounds = array<i64: 8, 64>}, {pipeline_mode = #tpu.pipeline_mode<synchronous>, transform_indices = @transform_3, window_bounds = array<i64: 1, 16>}, {pipeline_mode = #tpu.pipeline_mode<synchronous>, transform_indices = @transform_4, window_bounds = array<i64: 16, 64>}, {pipeline_mode = #tpu.pipeline_mode<synchronous>, transform_indices = @transform_5, window_bounds = array<i64: 1, 16>}, {pipeline_mode = #tpu.pipeline_mode<synchronous>, transform_indices = @transform_6, window_bounds = array<i64: 4, 32>}, {transform_indices = @transform_7, window_bounds = array<i64: 1, 4, 16>}]} {
    %c0 = arith.constant 0 : index
    %c0_0 = arith.constant 0 : index
    %c0_1 = arith.constant 0 : index
    %0 = vector.load %arg2[%c0, %c0_0, %c0_1] : memref<1x32x8xf32, #tpu.memory_space<vmem>>, vector<1x32x8xf32>
    %1 = vector.shape_cast %0 : vector<1x32x8xf32> to vector<32x8xf32>
    %c0_2 = arith.constant 0 : index
    %c0_3 = arith.constant 0 : index
    %2 = vector.load %arg3[%c0_2, %c0_3] : memref<8x64xf32, #tpu.memory_space<vmem>>, vector<8x64xf32>
    %c0_4 = arith.constant 0 : index
    %c0_5 = arith.constant 0 : index
    %3 = vector.load %arg4[%c0_4, %c0_5] : memref<1x16xf32, #tpu.memory_space<vmem>>, vector<1x16xf32>
    %cst = arith.constant dense<0.000000e+00> : vector<32x64xf32>
    %4 = tpu.matmul %1, %2, %cst {dimension_numbers = #tpu.dot_dimension_numbers<[1], [0], [0], [1], [0, 0, 1, 1], [], []>} : vector<32x8xf32>, vector<8x64xf32>, vector<32x64xf32> -> vector<32x64xf32>
    %5 = vector.extract_strided_slice %4 {offsets = [0, 0], sizes = [32, 16], strides = [1, 1]} : vector<32x64xf32> to vector<32x16xf32>
    %6 = vector.broadcast %3 : vector<1x16xf32> to vector<32x16xf32>
    %7 = arith.addf %5, %6 : vector<32x16xf32>
    %c0_6 = arith.constant 0 : index
    %c0_7 = arith.constant 0 : index
    %c0_8 = arith.constant 0 : index
    %c0_9 = arith.constant 0 : index
    %8 = vector.load %arg1[%c0_6, %c0_7, %c0_8, %c0_9] : memref<1x3x32x32xf32, #tpu.memory_space<vmem>>, vector<1x1x32x32xf32>
    %9 = vector.shape_cast %8 : vector<1x1x32x32xf32> to vector<32x32xf32>
    %10 = vector.extract_strided_slice %4 {offsets = [0, 16], sizes = [32, 16], strides = [1, 1]} : vector<32x64xf32> to vector<32x16xf32>
    %cst_10 = arith.constant dense<0.000000e+00> : vector<32x16xf32>
    %11 = tpu.matmul %9, %10, %cst_10 {dimension_numbers = #tpu.dot_dimension_numbers<[1], [0], [0], [1], [0, 0, 1, 1], [], []>} : vector<32x32xf32>, vector<32x16xf32>, vector<32x16xf32> -> vector<32x16xf32>
    %12 = arith.addf %7, %11 : vector<32x16xf32>
    %c0_11 = arith.constant 0 : index
    %c1 = arith.constant 1 : index
    %c0_12 = arith.constant 0 : index
    %c0_13 = arith.constant 0 : index
    %13 = vector.load %arg1[%c0_11, %c1, %c0_12, %c0_13] : memref<1x3x32x32xf32, #tpu.memory_space<vmem>>, vector<1x1x32x32xf32>
    %14 = vector.shape_cast %13 : vector<1x1x32x32xf32> to vector<32x32xf32>
    %15 = vector.extract_strided_slice %4 {offsets = [0, 32], sizes = [32, 16], strides = [1, 1]} : vector<32x64xf32> to vector<32x16xf32>
    %cst_14 = arith.constant dense<0.000000e+00> : vector<32x16xf32>
    %16 = tpu.matmul %14, %15, %cst_14 {dimension_numbers = #tpu.dot_dimension_numbers<[1], [0], [0], [1], [0, 0, 1, 1], [], []>} : vector<32x32xf32>, vector<32x16xf32>, vector<32x16xf32> -> vector<32x16xf32>
    %17 = arith.addf %12, %16 : vector<32x16xf32>
    %c0_15 = arith.constant 0 : index
    %c2 = arith.constant 2 : index
    %c0_16 = arith.constant 0 : index
    %c0_17 = arith.constant 0 : index
    %18 = vector.load %arg1[%c0_15, %c2, %c0_16, %c0_17] : memref<1x3x32x32xf32, #tpu.memory_space<vmem>>, vector<1x1x32x32xf32>
    %19 = vector.shape_cast %18 : vector<1x1x32x32xf32> to vector<32x32xf32>
    %20 = vector.extract_strided_slice %4 {offsets = [0, 48], sizes = [32, 16], strides = [1, 1]} : vector<32x64xf32> to vector<32x16xf32>
    %cst_18 = arith.constant dense<0.000000e+00> : vector<32x16xf32>
    %21 = tpu.matmul %19, %20, %cst_18 {dimension_numbers = #tpu.dot_dimension_numbers<[1], [0], [0], [1], [0, 0, 1, 1], [], []>} : vector<32x32xf32>, vector<32x16xf32>, vector<32x16xf32> -> vector<32x16xf32>
    %22 = arith.addf %17, %21 : vector<32x16xf32>
    %cst_19 = arith.constant 0.000000e+00 : f32
    %23 = vector.broadcast %cst_19 : f32 to vector<32x16xf32>
    %24 = arith.maximumf %22, %23 : vector<32x16xf32>
    %c0_20 = arith.constant 0 : index
    %c0_21 = arith.constant 0 : index
    %25 = vector.load %arg5[%c0_20, %c0_21] : memref<16x64xf32, #tpu.memory_space<vmem>>, vector<16x64xf32>
    %c0_22 = arith.constant 0 : index
    %c0_23 = arith.constant 0 : index
    %26 = vector.load %arg6[%c0_22, %c0_23] : memref<1x16xf32, #tpu.memory_space<vmem>>, vector<1x16xf32>
    %cst_24 = arith.constant dense<0.000000e+00> : vector<32x64xf32>
    %27 = tpu.matmul %24, %25, %cst_24 {dimension_numbers = #tpu.dot_dimension_numbers<[1], [0], [0], [1], [0, 0, 1, 1], [], []>} : vector<32x16xf32>, vector<16x64xf32>, vector<32x64xf32> -> vector<32x64xf32>
    %28 = vector.extract_strided_slice %27 {offsets = [0, 0], sizes = [32, 16], strides = [1, 1]} : vector<32x64xf32> to vector<32x16xf32>
    %29 = vector.broadcast %26 : vector<1x16xf32> to vector<32x16xf32>
    %30 = arith.addf %28, %29 : vector<32x16xf32>
    %c0_25 = arith.constant 0 : index
    %c0_26 = arith.constant 0 : index
    %c0_27 = arith.constant 0 : index
    %c0_28 = arith.constant 0 : index
    %31 = vector.load %arg1[%c0_25, %c0_26, %c0_27, %c0_28] : memref<1x3x32x32xf32, #tpu.memory_space<vmem>>, vector<1x1x32x32xf32>
    %32 = vector.shape_cast %31 : vector<1x1x32x32xf32> to vector<32x32xf32>
    %33 = vector.extract_strided_slice %27 {offsets = [0, 16], sizes = [32, 16], strides = [1, 1]} : vector<32x64xf32> to vector<32x16xf32>
    %cst_29 = arith.constant dense<0.000000e+00> : vector<32x16xf32>
    %34 = tpu.matmul %32, %33, %cst_29 {dimension_numbers = #tpu.dot_dimension_numbers<[1], [0], [0], [1], [0, 0, 1, 1], [], []>} : vector<32x32xf32>, vector<32x16xf32>, vector<32x16xf32> -> vector<32x16xf32>
    %35 = arith.addf %30, %34 : vector<32x16xf32>
    %c0_30 = arith.constant 0 : index
    %c1_31 = arith.constant 1 : index
    %c0_32 = arith.constant 0 : index
    %c0_33 = arith.constant 0 : index
    %36 = vector.load %arg1[%c0_30, %c1_31, %c0_32, %c0_33] : memref<1x3x32x32xf32, #tpu.memory_space<vmem>>, vector<1x1x32x32xf32>
    %37 = vector.shape_cast %36 : vector<1x1x32x32xf32> to vector<32x32xf32>
    %38 = vector.extract_strided_slice %27 {offsets = [0, 32], sizes = [32, 16], strides = [1, 1]} : vector<32x64xf32> to vector<32x16xf32>
    %cst_34 = arith.constant dense<0.000000e+00> : vector<32x16xf32>
    %39 = tpu.matmul %37, %38, %cst_34 {dimension_numbers = #tpu.dot_dimension_numbers<[1], [0], [0], [1], [0, 0, 1, 1], [], []>} : vector<32x32xf32>, vector<32x16xf32>, vector<32x16xf32> -> vector<32x16xf32>
    %40 = arith.addf %35, %39 : vector<32x16xf32>
    %c0_35 = arith.constant 0 : index
    %c2_36 = arith.constant 2 : index
    %c0_37 = arith.constant 0 : index
    %c0_38 = arith.constant 0 : index
    %41 = vector.load %arg1[%c0_35, %c2_36, %c0_37, %c0_38] : memref<1x3x32x32xf32, #tpu.memory_space<vmem>>, vector<1x1x32x32xf32>
    %42 = vector.shape_cast %41 : vector<1x1x32x32xf32> to vector<32x32xf32>
    %43 = vector.extract_strided_slice %27 {offsets = [0, 48], sizes = [32, 16], strides = [1, 1]} : vector<32x64xf32> to vector<32x16xf32>
    %cst_39 = arith.constant dense<0.000000e+00> : vector<32x16xf32>
    %44 = tpu.matmul %42, %43, %cst_39 {dimension_numbers = #tpu.dot_dimension_numbers<[1], [0], [0], [1], [0, 0, 1, 1], [], []>} : vector<32x32xf32>, vector<32x16xf32>, vector<32x16xf32> -> vector<32x16xf32>
    %45 = arith.addf %40, %44 : vector<32x16xf32>
    %cst_40 = arith.constant 0.000000e+00 : f32
    %46 = vector.broadcast %cst_40 : f32 to vector<32x16xf32>
    %47 = arith.maximumf %45, %46 : vector<32x16xf32>
    %c0_41 = arith.constant 0 : index
    %c0_42 = arith.constant 0 : index
    %48 = vector.load %arg7[%c0_41, %c0_42] : memref<4x32xf32, #tpu.memory_space<vmem>>, vector<4x32xf32>
    %cst_43 = arith.constant dense<0.000000e+00> : vector<4x16xf32>
    %49 = tpu.matmul %48, %47, %cst_43 {dimension_numbers = #tpu.dot_dimension_numbers<[1], [0], [0], [1], [0, 0, 1, 1], [], []>} : vector<4x32xf32>, vector<32x16xf32>, vector<4x16xf32> -> vector<4x16xf32>
    %c0_44 = arith.constant 0 : index
    %c0_45 = arith.constant 0 : index
    %c0_46 = arith.constant 0 : index
    %50 = vector.load %arg8[%c0_44, %c0_45, %c0_46] : memref<1x4x16xf32, #tpu.memory_space<vmem>>, vector<1x4x16xf32>
    %51 = vector.shape_cast %50 : vector<1x4x16xf32> to vector<4x16xf32>
    %52 = vector.shape_cast %49 : vector<4x16xf32> to vector<1x4x16xf32>
    tpu.vector_store %arg8[%c0_44, %c0_45, %c0_46], %52 {strides = array<i32>} : memref<1x4x16xf32, #tpu.memory_space<vmem>>, vector<1x4x16xf32>,
    return
  }
  func.func @transform_0(%arg0: i32) -> (i32, i32, i32, i32) {
    %c0_i32 = arith.constant 0 : i32
    %c0_i32_0 = arith.constant 0 : i32
    %c0_i32_1 = arith.constant 0 : i32
    %c0_i32_2 = arith.constant 0 : i32
    return %arg0, %c0_i32, %c0_i32_0, %c0_i32_1 : i32, i32, i32, i32
  }
  func.func @transform_1(%arg0: i32) -> (i32, i32, i32) {
    %c0_i32 = arith.constant 0 : i32
    %c0_i32_0 = arith.constant 0 : i32
    %c0_i32_1 = arith.constant 0 : i32
    return %arg0, %c0_i32, %c0_i32_0 : i32, i32, i32
  }
  func.func @transform_2(%arg0: i32) -> (i32, i32) {
    %c0_i32 = arith.constant 0 : i32
    %c0_i32_0 = arith.constant 0 : i32
    %c0_i32_1 = arith.constant 0 : i32
    return %c0_i32, %c0_i32_0 : i32, i32
  }
  func.func @transform_3(%arg0: i32) -> (i32, i32) {
    %c0_i32 = arith.constant 0 : i32
    %c0_i32_0 = arith.constant 0 : i32
    %c0_i32_1 = arith.constant 0 : i32
    return %c0_i32, %c0_i32_0 : i32, i32
  }
  func.func @transform_4(%arg0: i32) -> (i32, i32) {
    %c0_i32 = arith.constant 0 : i32
    %c0_i32_0 = arith.constant 0 : i32
    %c0_i32_1 = arith.constant 0 : i32
    return %c0_i32, %c0_i32_0 : i32, i32
  }
  func.func @transform_5(%arg0: i32) -> (i32, i32) {
    %c0_i32 = arith.constant 0 : i32
    %c0_i32_0 = arith.constant 0 : i32
    %c0_i32_1 = arith.constant 0 : i32
    return %c0_i32, %c0_i32_0 : i32, i32
  }
  func.func @transform_6(%arg0: i32) -> (i32, i32) {
    %c0_i32 = arith.constant 0 : i32
    %c0_i32_0 = arith.constant 0 : i32
    %c0_i32_1 = arith.constant 0 : i32
    return %c0_i32, %c0_i32_0 : i32, i32
  }
  func.func @transform_7(%arg0: i32) -> (i32, i32, i32) {
    %c0_i32 = arith.constant 0 : i32
    %c0_i32_0 = arith.constant 0 : i32
    %c0_i32_1 = arith.constant 0 : i32
    return %arg0, %c0_i32, %c0_i32_0 : i32, i32, i32
  }
}

module attributes {stable_mosaic.version = 11 : i64} {
  func.func @_gru_seq_kernel(%arg0: i32, %arg1: memref<4x2x16xf32, #tpu.memory_space<vmem>>, %arg2: memref<16x48xf32, #tpu.memory_space<vmem>>, %arg3: memref<16x48xf32, #tpu.memory_space<vmem>>, %arg4: memref<1x48xf32, #tpu.memory_space<vmem>>, %arg5: memref<1x48xf32, #tpu.memory_space<vmem>>, %arg6: memref<2x16xf32, #tpu.memory_space<vmem>>) attributes {dimension_semantics = [#tpu.dimension_semantics<arbitrary>], iteration_bounds = array<i64: 1>, scalar_prefetch = 0 : i64, scratch_operands = 0 : i64, tpu.core_type = #tpu.core_type<tc>, window_params = [{pipeline_mode = #tpu.pipeline_mode<synchronous>, transform_indices = @transform_0, window_bounds = array<i64: 4, 2, 16>}, {pipeline_mode = #tpu.pipeline_mode<synchronous>, transform_indices = @transform_1, window_bounds = array<i64: 16, 48>}, {pipeline_mode = #tpu.pipeline_mode<synchronous>, transform_indices = @transform_2, window_bounds = array<i64: 16, 48>}, {pipeline_mode = #tpu.pipeline_mode<synchronous>, transform_indices = @transform_3, window_bounds = array<i64: 1, 48>}, {pipeline_mode = #tpu.pipeline_mode<synchronous>, transform_indices = @transform_4, window_bounds = array<i64: 1, 48>}, {pipeline_mode = #tpu.pipeline_mode<synchronous>, transform_indices = @transform_5, window_bounds = array<i64: 2, 16>}]} {
    %c0 = arith.constant 0 : index
    %c0_0 = arith.constant 0 : index
    %0 = vector.load %arg2[%c0, %c0_0] : memref<16x48xf32, #tpu.memory_space<vmem>>, vector<16x48xf32>
    %c0_1 = arith.constant 0 : index
    %c0_2 = arith.constant 0 : index
    %1 = vector.load %arg3[%c0_1, %c0_2] : memref<16x48xf32, #tpu.memory_space<vmem>>, vector<16x48xf32>
    %c0_3 = arith.constant 0 : index
    %c0_4 = arith.constant 0 : index
    %2 = vector.load %arg4[%c0_3, %c0_4] : memref<1x48xf32, #tpu.memory_space<vmem>>, vector<1x48xf32>
    %c0_5 = arith.constant 0 : index
    %c0_6 = arith.constant 0 : index
    %3 = vector.load %arg5[%c0_5, %c0_6] : memref<1x48xf32, #tpu.memory_space<vmem>>, vector<1x48xf32>
    %cst = arith.constant 0.000000e+00 : f32
    %4 = vector.broadcast %cst : f32 to vector<2x16xf32>
    %c0_i32 = arith.constant 0 : i32
    %5 = arith.index_cast %c0_i32 : i32 to index
    %c0_7 = arith.constant 0 : index
    %c0_8 = arith.constant 0 : index
    %6 = vector.load %arg1[%5, %c0_7, %c0_8] : memref<4x2x16xf32, #tpu.memory_space<vmem>>, vector<1x2x16xf32>
    %7 = vector.shape_cast %6 : vector<1x2x16xf32> to vector<2x16xf32>
    %cst_9 = arith.constant dense<0.000000e+00> : vector<2x48xf32>
    %8 = tpu.matmul %7, %0, %cst_9 {dimension_numbers = #tpu.dot_dimension_numbers<[1], [0], [0], [1], [0, 0, 1, 1], [], []>} : vector<2x16xf32>, vector<16x48xf32>, vector<2x48xf32> -> vector<2x48xf32>
    %9 = vector.broadcast %2 : vector<1x48xf32> to vector<2x48xf32>
    %10 = arith.addf %8, %9 : vector<2x48xf32>
    %cst_10 = arith.constant dense<0.000000e+00> : vector<2x48xf32>
    %11 = tpu.matmul %4, %1, %cst_10 {dimension_numbers = #tpu.dot_dimension_numbers<[1], [0], [0], [1], [0, 0, 1, 1], [], []>} : vector<2x16xf32>, vector<16x48xf32>, vector<2x48xf32> -> vector<2x48xf32>
    %12 = vector.broadcast %3 : vector<1x48xf32> to vector<2x48xf32>
    %13 = arith.addf %11, %12 : vector<2x48xf32>
    %14 = vector.extract_strided_slice %10 {offsets = [0, 0], sizes = [2, 16], strides = [1, 1]} : vector<2x48xf32> to vector<2x16xf32>
    %15 = vector.extract_strided_slice %13 {offsets = [0, 0], sizes = [2, 16], strides = [1, 1]} : vector<2x48xf32> to vector<2x16xf32>
    %16 = arith.addf %14, %15 : vector<2x16xf32>
    %17 = arith.negf %16 : vector<2x16xf32>
    %18 = math.exp %17 : vector<2x16xf32>
    %cst_11 = arith.constant 1.000000e+00 : f32
    %19 = vector.broadcast %cst_11 : f32 to vector<2x16xf32>
    %20 = arith.addf %19, %18 : vector<2x16xf32>
    %21 = arith.divf %19, %20 : vector<2x16xf32>
    %22 = vector.extract_strided_slice %10 {offsets = [0, 16], sizes = [2, 16], strides = [1, 1]} : vector<2x48xf32> to vector<2x16xf32>
    %23 = vector.extract_strided_slice %13 {offsets = [0, 16], sizes = [2, 16], strides = [1, 1]} : vector<2x48xf32> to vector<2x16xf32>
    %24 = arith.addf %22, %23 : vector<2x16xf32>
    %25 = arith.negf %24 : vector<2x16xf32>
    %26 = math.exp %25 : vector<2x16xf32>
    %cst_12 = arith.constant 1.000000e+00 : f32
    %27 = vector.broadcast %cst_12 : f32 to vector<2x16xf32>
    %28 = arith.addf %27, %26 : vector<2x16xf32>
    %29 = arith.divf %27, %28 : vector<2x16xf32>
    %30 = vector.extract_strided_slice %10 {offsets = [0, 32], sizes = [2, 16], strides = [1, 1]} : vector<2x48xf32> to vector<2x16xf32>
    %31 = vector.extract_strided_slice %13 {offsets = [0, 32], sizes = [2, 16], strides = [1, 1]} : vector<2x48xf32> to vector<2x16xf32>
    %32 = arith.mulf %21, %31 : vector<2x16xf32>
    %33 = arith.addf %30, %32 : vector<2x16xf32>
    %34 = math.tanh %33 : vector<2x16xf32>
    %cst_13 = arith.constant 1.000000e+00 : f32
    %35 = vector.broadcast %cst_13 : f32 to vector<2x16xf32>
    %36 = arith.subf %35, %29 : vector<2x16xf32>
    %37 = arith.mulf %36, %34 : vector<2x16xf32>
    %38 = arith.mulf %29, %4 : vector<2x16xf32>
    %39 = arith.addf %37, %38 : vector<2x16xf32>
    %c1_i32 = arith.constant 1 : i32
    %40 = arith.index_cast %c1_i32 : i32 to index
    %c0_14 = arith.constant 0 : index
    %c0_15 = arith.constant 0 : index
    %41 = vector.load %arg1[%40, %c0_14, %c0_15] : memref<4x2x16xf32, #tpu.memory_space<vmem>>, vector<1x2x16xf32>
    %42 = vector.shape_cast %41 : vector<1x2x16xf32> to vector<2x16xf32>
    %cst_16 = arith.constant dense<0.000000e+00> : vector<2x48xf32>
    %43 = tpu.matmul %42, %0, %cst_16 {dimension_numbers = #tpu.dot_dimension_numbers<[1], [0], [0], [1], [0, 0, 1, 1], [], []>} : vector<2x16xf32>, vector<16x48xf32>, vector<2x48xf32> -> vector<2x48xf32>
    %44 = vector.broadcast %2 : vector<1x48xf32> to vector<2x48xf32>
    %45 = arith.addf %43, %44 : vector<2x48xf32>
    %cst_17 = arith.constant dense<0.000000e+00> : vector<2x48xf32>
    %46 = tpu.matmul %39, %1, %cst_17 {dimension_numbers = #tpu.dot_dimension_numbers<[1], [0], [0], [1], [0, 0, 1, 1], [], []>} : vector<2x16xf32>, vector<16x48xf32>, vector<2x48xf32> -> vector<2x48xf32>
    %47 = vector.broadcast %3 : vector<1x48xf32> to vector<2x48xf32>
    %48 = arith.addf %46, %47 : vector<2x48xf32>
    %49 = vector.extract_strided_slice %45 {offsets = [0, 0], sizes = [2, 16], strides = [1, 1]} : vector<2x48xf32> to vector<2x16xf32>
    %50 = vector.extract_strided_slice %48 {offsets = [0, 0], sizes = [2, 16], strides = [1, 1]} : vector<2x48xf32> to vector<2x16xf32>
    %51 = arith.addf %49, %50 : vector<2x16xf32>
    %52 = arith.negf %51 : vector<2x16xf32>
    %53 = math.exp %52 : vector<2x16xf32>
    %cst_18 = arith.constant 1.000000e+00 : f32
    %54 = vector.broadcast %cst_18 : f32 to vector<2x16xf32>
    %55 = arith.addf %54, %53 : vector<2x16xf32>
    %56 = arith.divf %54, %55 : vector<2x16xf32>
    %57 = vector.extract_strided_slice %45 {offsets = [0, 16], sizes = [2, 16], strides = [1, 1]} : vector<2x48xf32> to vector<2x16xf32>
    %58 = vector.extract_strided_slice %48 {offsets = [0, 16], sizes = [2, 16], strides = [1, 1]} : vector<2x48xf32> to vector<2x16xf32>
    %59 = arith.addf %57, %58 : vector<2x16xf32>
    %60 = arith.negf %59 : vector<2x16xf32>
    %61 = math.exp %60 : vector<2x16xf32>
    %cst_19 = arith.constant 1.000000e+00 : f32
    %62 = vector.broadcast %cst_19 : f32 to vector<2x16xf32>
    %63 = arith.addf %62, %61 : vector<2x16xf32>
    %64 = arith.divf %62, %63 : vector<2x16xf32>
    %65 = vector.extract_strided_slice %45 {offsets = [0, 32], sizes = [2, 16], strides = [1, 1]} : vector<2x48xf32> to vector<2x16xf32>
    %66 = vector.extract_strided_slice %48 {offsets = [0, 32], sizes = [2, 16], strides = [1, 1]} : vector<2x48xf32> to vector<2x16xf32>
    %67 = arith.mulf %56, %66 : vector<2x16xf32>
    %68 = arith.addf %65, %67 : vector<2x16xf32>
    %69 = math.tanh %68 : vector<2x16xf32>
    %cst_20 = arith.constant 1.000000e+00 : f32
    %70 = vector.broadcast %cst_20 : f32 to vector<2x16xf32>
    %71 = arith.subf %70, %64 : vector<2x16xf32>
    %72 = arith.mulf %71, %69 : vector<2x16xf32>
    %73 = arith.mulf %64, %39 : vector<2x16xf32>
    %74 = arith.addf %72, %73 : vector<2x16xf32>
    %c2_i32 = arith.constant 2 : i32
    %75 = arith.index_cast %c2_i32 : i32 to index
    %c0_21 = arith.constant 0 : index
    %c0_22 = arith.constant 0 : index
    %76 = vector.load %arg1[%75, %c0_21, %c0_22] : memref<4x2x16xf32, #tpu.memory_space<vmem>>, vector<1x2x16xf32>
    %77 = vector.shape_cast %76 : vector<1x2x16xf32> to vector<2x16xf32>
    %cst_23 = arith.constant dense<0.000000e+00> : vector<2x48xf32>
    %78 = tpu.matmul %77, %0, %cst_23 {dimension_numbers = #tpu.dot_dimension_numbers<[1], [0], [0], [1], [0, 0, 1, 1], [], []>} : vector<2x16xf32>, vector<16x48xf32>, vector<2x48xf32> -> vector<2x48xf32>
    %79 = vector.broadcast %2 : vector<1x48xf32> to vector<2x48xf32>
    %80 = arith.addf %78, %79 : vector<2x48xf32>
    %cst_24 = arith.constant dense<0.000000e+00> : vector<2x48xf32>
    %81 = tpu.matmul %74, %1, %cst_24 {dimension_numbers = #tpu.dot_dimension_numbers<[1], [0], [0], [1], [0, 0, 1, 1], [], []>} : vector<2x16xf32>, vector<16x48xf32>, vector<2x48xf32> -> vector<2x48xf32>
    %82 = vector.broadcast %3 : vector<1x48xf32> to vector<2x48xf32>
    %83 = arith.addf %81, %82 : vector<2x48xf32>
    %84 = vector.extract_strided_slice %80 {offsets = [0, 0], sizes = [2, 16], strides = [1, 1]} : vector<2x48xf32> to vector<2x16xf32>
    %85 = vector.extract_strided_slice %83 {offsets = [0, 0], sizes = [2, 16], strides = [1, 1]} : vector<2x48xf32> to vector<2x16xf32>
    %86 = arith.addf %84, %85 : vector<2x16xf32>
    %87 = arith.negf %86 : vector<2x16xf32>
    %88 = math.exp %87 : vector<2x16xf32>
    %cst_25 = arith.constant 1.000000e+00 : f32
    %89 = vector.broadcast %cst_25 : f32 to vector<2x16xf32>
    %90 = arith.addf %89, %88 : vector<2x16xf32>
    %91 = arith.divf %89, %90 : vector<2x16xf32>
    %92 = vector.extract_strided_slice %80 {offsets = [0, 16], sizes = [2, 16], strides = [1, 1]} : vector<2x48xf32> to vector<2x16xf32>
    %93 = vector.extract_strided_slice %83 {offsets = [0, 16], sizes = [2, 16], strides = [1, 1]} : vector<2x48xf32> to vector<2x16xf32>
    %94 = arith.addf %92, %93 : vector<2x16xf32>
    %95 = arith.negf %94 : vector<2x16xf32>
    %96 = math.exp %95 : vector<2x16xf32>
    %cst_26 = arith.constant 1.000000e+00 : f32
    %97 = vector.broadcast %cst_26 : f32 to vector<2x16xf32>
    %98 = arith.addf %97, %96 : vector<2x16xf32>
    %99 = arith.divf %97, %98 : vector<2x16xf32>
    %100 = vector.extract_strided_slice %80 {offsets = [0, 32], sizes = [2, 16], strides = [1, 1]} : vector<2x48xf32> to vector<2x16xf32>
    %101 = vector.extract_strided_slice %83 {offsets = [0, 32], sizes = [2, 16], strides = [1, 1]} : vector<2x48xf32> to vector<2x16xf32>
    %102 = arith.mulf %91, %101 : vector<2x16xf32>
    %103 = arith.addf %100, %102 : vector<2x16xf32>
    %104 = math.tanh %103 : vector<2x16xf32>
    %cst_27 = arith.constant 1.000000e+00 : f32
    %105 = vector.broadcast %cst_27 : f32 to vector<2x16xf32>
    %106 = arith.subf %105, %99 : vector<2x16xf32>
    %107 = arith.mulf %106, %104 : vector<2x16xf32>
    %108 = arith.mulf %99, %74 : vector<2x16xf32>
    %109 = arith.addf %107, %108 : vector<2x16xf32>
    %c3_i32 = arith.constant 3 : i32
    %110 = arith.index_cast %c3_i32 : i32 to index
    %c0_28 = arith.constant 0 : index
    %c0_29 = arith.constant 0 : index
    %111 = vector.load %arg1[%110, %c0_28, %c0_29] : memref<4x2x16xf32, #tpu.memory_space<vmem>>, vector<1x2x16xf32>
    %112 = vector.shape_cast %111 : vector<1x2x16xf32> to vector<2x16xf32>
    %cst_30 = arith.constant dense<0.000000e+00> : vector<2x48xf32>
    %113 = tpu.matmul %112, %0, %cst_30 {dimension_numbers = #tpu.dot_dimension_numbers<[1], [0], [0], [1], [0, 0, 1, 1], [], []>} : vector<2x16xf32>, vector<16x48xf32>, vector<2x48xf32> -> vector<2x48xf32>
    %114 = vector.broadcast %2 : vector<1x48xf32> to vector<2x48xf32>
    %115 = arith.addf %113, %114 : vector<2x48xf32>
    %cst_31 = arith.constant dense<0.000000e+00> : vector<2x48xf32>
    %116 = tpu.matmul %109, %1, %cst_31 {dimension_numbers = #tpu.dot_dimension_numbers<[1], [0], [0], [1], [0, 0, 1, 1], [], []>} : vector<2x16xf32>, vector<16x48xf32>, vector<2x48xf32> -> vector<2x48xf32>
    %117 = vector.broadcast %3 : vector<1x48xf32> to vector<2x48xf32>
    %118 = arith.addf %116, %117 : vector<2x48xf32>
    %119 = vector.extract_strided_slice %115 {offsets = [0, 0], sizes = [2, 16], strides = [1, 1]} : vector<2x48xf32> to vector<2x16xf32>
    %120 = vector.extract_strided_slice %118 {offsets = [0, 0], sizes = [2, 16], strides = [1, 1]} : vector<2x48xf32> to vector<2x16xf32>
    %121 = arith.addf %119, %120 : vector<2x16xf32>
    %122 = arith.negf %121 : vector<2x16xf32>
    %123 = math.exp %122 : vector<2x16xf32>
    %cst_32 = arith.constant 1.000000e+00 : f32
    %124 = vector.broadcast %cst_32 : f32 to vector<2x16xf32>
    %125 = arith.addf %124, %123 : vector<2x16xf32>
    %126 = arith.divf %124, %125 : vector<2x16xf32>
    %127 = vector.extract_strided_slice %115 {offsets = [0, 16], sizes = [2, 16], strides = [1, 1]} : vector<2x48xf32> to vector<2x16xf32>
    %128 = vector.extract_strided_slice %118 {offsets = [0, 16], sizes = [2, 16], strides = [1, 1]} : vector<2x48xf32> to vector<2x16xf32>
    %129 = arith.addf %127, %128 : vector<2x16xf32>
    %130 = arith.negf %129 : vector<2x16xf32>
    %131 = math.exp %130 : vector<2x16xf32>
    %cst_33 = arith.constant 1.000000e+00 : f32
    %132 = vector.broadcast %cst_33 : f32 to vector<2x16xf32>
    %133 = arith.addf %132, %131 : vector<2x16xf32>
    %134 = arith.divf %132, %133 : vector<2x16xf32>
    %135 = vector.extract_strided_slice %115 {offsets = [0, 32], sizes = [2, 16], strides = [1, 1]} : vector<2x48xf32> to vector<2x16xf32>
    %136 = vector.extract_strided_slice %118 {offsets = [0, 32], sizes = [2, 16], strides = [1, 1]} : vector<2x48xf32> to vector<2x16xf32>
    %137 = arith.mulf %126, %136 : vector<2x16xf32>
    %138 = arith.addf %135, %137 : vector<2x16xf32>
    %139 = math.tanh %138 : vector<2x16xf32>
    %cst_34 = arith.constant 1.000000e+00 : f32
    %140 = vector.broadcast %cst_34 : f32 to vector<2x16xf32>
    %141 = arith.subf %140, %134 : vector<2x16xf32>
    %142 = arith.mulf %141, %139 : vector<2x16xf32>
    %143 = arith.mulf %134, %109 : vector<2x16xf32>
    %144 = arith.addf %142, %143 : vector<2x16xf32>
    %c4_i32 = arith.constant 4 : i32
    %c0_35 = arith.constant 0 : index
    %c0_36 = arith.constant 0 : index
    %145 = vector.load %arg6[%c0_35, %c0_36] : memref<2x16xf32, #tpu.memory_space<vmem>>, vector<2x16xf32>
    tpu.vector_store %arg6[%c0_35, %c0_36], %144 {strides = array<i32>} : memref<2x16xf32, #tpu.memory_space<vmem>>, vector<2x16xf32>,
    return
  }
  func.func @transform_0(%arg0: i32) -> (i32, i32, i32) {
    %c0_i32 = arith.constant 0 : i32
    %c0_i32_0 = arith.constant 0 : i32
    %c0_i32_1 = arith.constant 0 : i32
    %c0_i32_2 = arith.constant 0 : i32
    return %c0_i32, %c0_i32_0, %c0_i32_1 : i32, i32, i32
  }
  func.func @transform_1(%arg0: i32) -> (i32, i32) {
    %c0_i32 = arith.constant 0 : i32
    %c0_i32_0 = arith.constant 0 : i32
    %c0_i32_1 = arith.constant 0 : i32
    return %c0_i32, %c0_i32_0 : i32, i32
  }
  func.func @transform_2(%arg0: i32) -> (i32, i32) {
    %c0_i32 = arith.constant 0 : i32
    %c0_i32_0 = arith.constant 0 : i32
    %c0_i32_1 = arith.constant 0 : i32
    return %c0_i32, %c0_i32_0 : i32, i32
  }
  func.func @transform_3(%arg0: i32) -> (i32, i32) {
    %c0_i32 = arith.constant 0 : i32
    %c0_i32_0 = arith.constant 0 : i32
    %c0_i32_1 = arith.constant 0 : i32
    return %c0_i32, %c0_i32_0 : i32, i32
  }
  func.func @transform_4(%arg0: i32) -> (i32, i32) {
    %c0_i32 = arith.constant 0 : i32
    %c0_i32_0 = arith.constant 0 : i32
    %c0_i32_1 = arith.constant 0 : i32
    return %c0_i32, %c0_i32_0 : i32, i32
  }
  func.func @transform_5(%arg0: i32) -> (i32, i32) {
    %c0_i32 = arith.constant 0 : i32
    %c0_i32_0 = arith.constant 0 : i32
    %c0_i32_1 = arith.constant 0 : i32
    return %c0_i32, %c0_i32_0 : i32, i32
  }
}

module attributes {stable_mosaic.version = 11 : i64} {
  func.func @_rgn_encoder_kernel(%arg0: i32, %arg1: memref<1x3x8x8xf32, #tpu.memory_space<vmem>>, %arg2: memref<1x8x8xf32, #tpu.memory_space<vmem>>, %arg3: memref<8x64xf32, #tpu.memory_space<vmem>>, %arg4: memref<1x16xf32, #tpu.memory_space<vmem>>, %arg5: memref<16x64xf32, #tpu.memory_space<vmem>>, %arg6: memref<1x16xf32, #tpu.memory_space<vmem>>, %arg7: memref<1x8x16xf32, #tpu.memory_space<vmem>>) attributes {dimension_semantics = [#tpu.dimension_semantics<parallel>], iteration_bounds = array<i64: 2>, scalar_prefetch = 0 : i64, scratch_operands = 0 : i64, tpu.core_type = #tpu.core_type<tc>, window_params = [{transform_indices = @transform_0, window_bounds = array<i64: 1, 3, 8, 8>}, {transform_indices = @transform_1, window_bounds = array<i64: 1, 8, 8>}, {pipeline_mode = #tpu.pipeline_mode<synchronous>, transform_indices = @transform_2, window_bounds = array<i64: 8, 64>}, {pipeline_mode = #tpu.pipeline_mode<synchronous>, transform_indices = @transform_3, window_bounds = array<i64: 1, 16>}, {pipeline_mode = #tpu.pipeline_mode<synchronous>, transform_indices = @transform_4, window_bounds = array<i64: 16, 64>}, {pipeline_mode = #tpu.pipeline_mode<synchronous>, transform_indices = @transform_5, window_bounds = array<i64: 1, 16>}, {transform_indices = @transform_6, window_bounds = array<i64: 1, 8, 16>}]} {
    %c0 = arith.constant 0 : index
    %c0_0 = arith.constant 0 : index
    %c0_1 = arith.constant 0 : index
    %0 = vector.load %arg2[%c0, %c0_0, %c0_1] : memref<1x8x8xf32, #tpu.memory_space<vmem>>, vector<1x8x8xf32>
    %1 = vector.shape_cast %0 : vector<1x8x8xf32> to vector<8x8xf32>
    %c0_2 = arith.constant 0 : index
    %c0_3 = arith.constant 0 : index
    %2 = vector.load %arg3[%c0_2, %c0_3] : memref<8x64xf32, #tpu.memory_space<vmem>>, vector<8x64xf32>
    %c0_4 = arith.constant 0 : index
    %c0_5 = arith.constant 0 : index
    %3 = vector.load %arg4[%c0_4, %c0_5] : memref<1x16xf32, #tpu.memory_space<vmem>>, vector<1x16xf32>
    %cst = arith.constant dense<0.000000e+00> : vector<8x64xf32>
    %4 = tpu.matmul %1, %2, %cst {dimension_numbers = #tpu.dot_dimension_numbers<[1], [0], [0], [1], [0, 0, 1, 1], [], []>} : vector<8x8xf32>, vector<8x64xf32>, vector<8x64xf32> -> vector<8x64xf32>
    %5 = vector.extract_strided_slice %4 {offsets = [0, 0], sizes = [8, 16], strides = [1, 1]} : vector<8x64xf32> to vector<8x16xf32>
    %6 = vector.broadcast %3 : vector<1x16xf32> to vector<8x16xf32>
    %7 = arith.addf %5, %6 : vector<8x16xf32>
    %c0_6 = arith.constant 0 : index
    %c0_7 = arith.constant 0 : index
    %c0_8 = arith.constant 0 : index
    %c0_9 = arith.constant 0 : index
    %8 = vector.load %arg1[%c0_6, %c0_7, %c0_8, %c0_9] : memref<1x3x8x8xf32, #tpu.memory_space<vmem>>, vector<1x1x8x8xf32>
    %9 = vector.shape_cast %8 : vector<1x1x8x8xf32> to vector<8x8xf32>
    %10 = vector.extract_strided_slice %4 {offsets = [0, 16], sizes = [8, 16], strides = [1, 1]} : vector<8x64xf32> to vector<8x16xf32>
    %cst_10 = arith.constant dense<0.000000e+00> : vector<8x16xf32>
    %11 = tpu.matmul %9, %10, %cst_10 {dimension_numbers = #tpu.dot_dimension_numbers<[1], [0], [0], [1], [0, 0, 1, 1], [], []>} : vector<8x8xf32>, vector<8x16xf32>, vector<8x16xf32> -> vector<8x16xf32>
    %12 = arith.addf %7, %11 : vector<8x16xf32>
    %c0_11 = arith.constant 0 : index
    %c1 = arith.constant 1 : index
    %c0_12 = arith.constant 0 : index
    %c0_13 = arith.constant 0 : index
    %13 = vector.load %arg1[%c0_11, %c1, %c0_12, %c0_13] : memref<1x3x8x8xf32, #tpu.memory_space<vmem>>, vector<1x1x8x8xf32>
    %14 = vector.shape_cast %13 : vector<1x1x8x8xf32> to vector<8x8xf32>
    %15 = vector.extract_strided_slice %4 {offsets = [0, 32], sizes = [8, 16], strides = [1, 1]} : vector<8x64xf32> to vector<8x16xf32>
    %cst_14 = arith.constant dense<0.000000e+00> : vector<8x16xf32>
    %16 = tpu.matmul %14, %15, %cst_14 {dimension_numbers = #tpu.dot_dimension_numbers<[1], [0], [0], [1], [0, 0, 1, 1], [], []>} : vector<8x8xf32>, vector<8x16xf32>, vector<8x16xf32> -> vector<8x16xf32>
    %17 = arith.addf %12, %16 : vector<8x16xf32>
    %c0_15 = arith.constant 0 : index
    %c2 = arith.constant 2 : index
    %c0_16 = arith.constant 0 : index
    %c0_17 = arith.constant 0 : index
    %18 = vector.load %arg1[%c0_15, %c2, %c0_16, %c0_17] : memref<1x3x8x8xf32, #tpu.memory_space<vmem>>, vector<1x1x8x8xf32>
    %19 = vector.shape_cast %18 : vector<1x1x8x8xf32> to vector<8x8xf32>
    %20 = vector.extract_strided_slice %4 {offsets = [0, 48], sizes = [8, 16], strides = [1, 1]} : vector<8x64xf32> to vector<8x16xf32>
    %cst_18 = arith.constant dense<0.000000e+00> : vector<8x16xf32>
    %21 = tpu.matmul %19, %20, %cst_18 {dimension_numbers = #tpu.dot_dimension_numbers<[1], [0], [0], [1], [0, 0, 1, 1], [], []>} : vector<8x8xf32>, vector<8x16xf32>, vector<8x16xf32> -> vector<8x16xf32>
    %22 = arith.addf %17, %21 : vector<8x16xf32>
    %cst_19 = arith.constant 0.000000e+00 : f32
    %23 = vector.broadcast %cst_19 : f32 to vector<8x16xf32>
    %24 = arith.maximumf %22, %23 : vector<8x16xf32>
    %c0_20 = arith.constant 0 : index
    %c0_21 = arith.constant 0 : index
    %25 = vector.load %arg5[%c0_20, %c0_21] : memref<16x64xf32, #tpu.memory_space<vmem>>, vector<16x64xf32>
    %c0_22 = arith.constant 0 : index
    %c0_23 = arith.constant 0 : index
    %26 = vector.load %arg6[%c0_22, %c0_23] : memref<1x16xf32, #tpu.memory_space<vmem>>, vector<1x16xf32>
    %cst_24 = arith.constant dense<0.000000e+00> : vector<8x64xf32>
    %27 = tpu.matmul %24, %25, %cst_24 {dimension_numbers = #tpu.dot_dimension_numbers<[1], [0], [0], [1], [0, 0, 1, 1], [], []>} : vector<8x16xf32>, vector<16x64xf32>, vector<8x64xf32> -> vector<8x64xf32>
    %28 = vector.extract_strided_slice %27 {offsets = [0, 0], sizes = [8, 16], strides = [1, 1]} : vector<8x64xf32> to vector<8x16xf32>
    %29 = vector.broadcast %26 : vector<1x16xf32> to vector<8x16xf32>
    %30 = arith.addf %28, %29 : vector<8x16xf32>
    %c0_25 = arith.constant 0 : index
    %c0_26 = arith.constant 0 : index
    %c0_27 = arith.constant 0 : index
    %c0_28 = arith.constant 0 : index
    %31 = vector.load %arg1[%c0_25, %c0_26, %c0_27, %c0_28] : memref<1x3x8x8xf32, #tpu.memory_space<vmem>>, vector<1x1x8x8xf32>
    %32 = vector.shape_cast %31 : vector<1x1x8x8xf32> to vector<8x8xf32>
    %33 = vector.extract_strided_slice %27 {offsets = [0, 16], sizes = [8, 16], strides = [1, 1]} : vector<8x64xf32> to vector<8x16xf32>
    %cst_29 = arith.constant dense<0.000000e+00> : vector<8x16xf32>
    %34 = tpu.matmul %32, %33, %cst_29 {dimension_numbers = #tpu.dot_dimension_numbers<[1], [0], [0], [1], [0, 0, 1, 1], [], []>} : vector<8x8xf32>, vector<8x16xf32>, vector<8x16xf32> -> vector<8x16xf32>
    %35 = arith.addf %30, %34 : vector<8x16xf32>
    %c0_30 = arith.constant 0 : index
    %c1_31 = arith.constant 1 : index
    %c0_32 = arith.constant 0 : index
    %c0_33 = arith.constant 0 : index
    %36 = vector.load %arg1[%c0_30, %c1_31, %c0_32, %c0_33] : memref<1x3x8x8xf32, #tpu.memory_space<vmem>>, vector<1x1x8x8xf32>
    %37 = vector.shape_cast %36 : vector<1x1x8x8xf32> to vector<8x8xf32>
    %38 = vector.extract_strided_slice %27 {offsets = [0, 32], sizes = [8, 16], strides = [1, 1]} : vector<8x64xf32> to vector<8x16xf32>
    %cst_34 = arith.constant dense<0.000000e+00> : vector<8x16xf32>
    %39 = tpu.matmul %37, %38, %cst_34 {dimension_numbers = #tpu.dot_dimension_numbers<[1], [0], [0], [1], [0, 0, 1, 1], [], []>} : vector<8x8xf32>, vector<8x16xf32>, vector<8x16xf32> -> vector<8x16xf32>
    %40 = arith.addf %35, %39 : vector<8x16xf32>
    %c0_35 = arith.constant 0 : index
    %c2_36 = arith.constant 2 : index
    %c0_37 = arith.constant 0 : index
    %c0_38 = arith.constant 0 : index
    %41 = vector.load %arg1[%c0_35, %c2_36, %c0_37, %c0_38] : memref<1x3x8x8xf32, #tpu.memory_space<vmem>>, vector<1x1x8x8xf32>
    %42 = vector.shape_cast %41 : vector<1x1x8x8xf32> to vector<8x8xf32>
    %43 = vector.extract_strided_slice %27 {offsets = [0, 48], sizes = [8, 16], strides = [1, 1]} : vector<8x64xf32> to vector<8x16xf32>
    %cst_39 = arith.constant dense<0.000000e+00> : vector<8x16xf32>
    %44 = tpu.matmul %42, %43, %cst_39 {dimension_numbers = #tpu.dot_dimension_numbers<[1], [0], [0], [1], [0, 0, 1, 1], [], []>} : vector<8x8xf32>, vector<8x16xf32>, vector<8x16xf32> -> vector<8x16xf32>
    %45 = arith.addf %40, %44 : vector<8x16xf32>
    %cst_40 = arith.constant 0.000000e+00 : f32
    %46 = vector.broadcast %cst_40 : f32 to vector<8x16xf32>
    %47 = arith.maximumf %45, %46 : vector<8x16xf32>
    %c0_41 = arith.constant 0 : index
    %c0_42 = arith.constant 0 : index
    %c0_43 = arith.constant 0 : index
    %48 = vector.load %arg7[%c0_41, %c0_42, %c0_43] : memref<1x8x16xf32, #tpu.memory_space<vmem>>, vector<1x8x16xf32>
    %49 = vector.shape_cast %48 : vector<1x8x16xf32> to vector<8x16xf32>
    %50 = vector.shape_cast %47 : vector<8x16xf32> to vector<1x8x16xf32>
    tpu.vector_store %arg7[%c0_41, %c0_42, %c0_43], %50 {strides = array<i32>} : memref<1x8x16xf32, #tpu.memory_space<vmem>>, vector<1x8x16xf32>,
    return
  }
  func.func @transform_0(%arg0: i32) -> (i32, i32, i32, i32) {
    %c0_i32 = arith.constant 0 : i32
    %c0_i32_0 = arith.constant 0 : i32
    %c0_i32_1 = arith.constant 0 : i32
    %c0_i32_2 = arith.constant 0 : i32
    return %arg0, %c0_i32, %c0_i32_0, %c0_i32_1 : i32, i32, i32, i32
  }
  func.func @transform_1(%arg0: i32) -> (i32, i32, i32) {
    %c0_i32 = arith.constant 0 : i32
    %c0_i32_0 = arith.constant 0 : i32
    %c0_i32_1 = arith.constant 0 : i32
    return %arg0, %c0_i32, %c0_i32_0 : i32, i32, i32
  }
  func.func @transform_2(%arg0: i32) -> (i32, i32) {
    %c0_i32 = arith.constant 0 : i32
    %c0_i32_0 = arith.constant 0 : i32
    %c0_i32_1 = arith.constant 0 : i32
    return %c0_i32, %c0_i32_0 : i32, i32
  }
  func.func @transform_3(%arg0: i32) -> (i32, i32) {
    %c0_i32 = arith.constant 0 : i32
    %c0_i32_0 = arith.constant 0 : i32
    %c0_i32_1 = arith.constant 0 : i32
    return %c0_i32, %c0_i32_0 : i32, i32
  }
  func.func @transform_4(%arg0: i32) -> (i32, i32) {
    %c0_i32 = arith.constant 0 : i32
    %c0_i32_0 = arith.constant 0 : i32
    %c0_i32_1 = arith.constant 0 : i32
    return %c0_i32, %c0_i32_0 : i32, i32
  }
  func.func @transform_5(%arg0: i32) -> (i32, i32) {
    %c0_i32 = arith.constant 0 : i32
    %c0_i32_0 = arith.constant 0 : i32
    %c0_i32_1 = arith.constant 0 : i32
    return %c0_i32, %c0_i32_0 : i32, i32
  }
  func.func @transform_6(%arg0: i32) -> (i32, i32, i32) {
    %c0_i32 = arith.constant 0 : i32
    %c0_i32_0 = arith.constant 0 : i32
    %c0_i32_1 = arith.constant 0 : i32
    return %arg0, %c0_i32, %c0_i32_0 : i32, i32, i32
  }
}

</mosaic_0001>

<bundles_post_ra>
// kernel: _lambda_.5
= control target key start
LH: loop header
LB: loop body
LE: loop exit
PB: predicated region body
PF: predicated region fallthrough
CT: control target
= control target key end

     0   :  { %s1121_s21 = smov 0   ;;  %s1202_s0 = inlined_call_operand.vmem [shape: f32[2,3,8,8], index: 0, kind: input, shape index: {}]   ;;  %s1203_s1 = inlined_call_operand.vmem [shape: f32[2,8,8], index: 1, kind: input, shape index: {}]   ;;  %s1204_s2 = inlined_call_operand.vmem [shape: f32[8,64], index: 2, kind: input, shape index: {}]   ;;  %s1205_s3 = inlined_call_operand.vmem [shape: f32[1,16], index: 3, kind: input, shape index: {}]   ;;  %s1206_s4 = inlined_call_operand.vmem [shape: f32[16,64], index: 4, kind: input, shape index: {}]   ;;  %s1207_s5 = inlined_call_operand.vmem [shape: f32[1,16], index: 5, kind: input, shape index: {}]   ;;  %s1208_s6 = inlined_call_operand.vmem [shape: f32[2,8,16], index: 6, kind: output, shape index: {}]  }
   0x1 LB: > { %s963_s22 = sadd.s32 4294967295, %s1078_s21   ;;  %p967_p0 = scmp.ge.s32.totalorder %s1078_s21, 1  ;;  %s1078_s21 = sphi %s1121_s21, %s16_s21  }
   0x2   : > { %p221_p1 = scmp.lt.s32.totalorder %s1078_s21, 3 }
   0x4   : > { %p222_p2 = pnand %p967_p0, %p221_p1 }
   0x5   : > { %v268_v0 = vld [vmem:[%s1204_s2] sm:$0xff] (!%p222_p2)  ;;  %p254_p3 = scmp.lt.s32.totalorder (!%p222_p2), %s963_s22, 1  ;;  %v1080_v1 = vmov (!%p222_p2), 0.0   ;;  %vm1081_vm0 = vmmov (!%p222_p2), 0   ;;  %vm270_vm1 = vcmask (!%p222_p2), 64512   ;;  %s1082_s29 = smov (!%p222_p2), 80  }
   0x6   : > { %225 = sbr.rel (%p222_p2) target bundleno = 1138 (0x472), region = 44  ;;  %1002 = vmatprep.subr.mxu0 (!%p222_p2), %v1080_v1  ;;  %1004 = vmatprep.mubr.msk.f32.mxu0 (!%p222_p2), %vm1081_vm0, %v1080_v1  ;;  %s1083_s30 = smov (!%p222_p2), 112   ;;  %v589_v11 = vld [vmem:[%s1206_s4] sm:$0xff] (!%p222_p2)  ;;  %v590_v12 = vld [vmem:[%s1206_s4 + $0x8] sm:$0xff] (!%p222_p2)  ;;  %v1085_v14 = vmov (!%p222_p2), 0.0|0.0   ;;  %vm592_vm2 = vcmask (!%p222_p2), 130048  }
   0x7   : > { %1003 = vmatpush3.msra.mxu0 (!%p222_p2), %v268_v0  ;;  %1007 = vmatprep.subr.mxu1 (!%p222_p2), %v1080_v1  ;;  %s1084_s7 = smov (!%p222_p2), 96   ;;  %v1045_v13 = vpack.c.bf16 (!%p222_p2), %v590_v12, %v589_v11  ;;  %v972_v15 = vld [vmem:[%s1205_s3] ss:$0 sm:$0xff] (!%p222_p2) }
   0x8   : > { %1009 = vmatprep.mubr.msk.f32.mxu1 (!%p222_p2), %vm1081_vm0, %v1080_v1  ;;  %1029 = vmatprep.subr.mxu0 (!%p222_p2), %v1080_v1  ;;  %v979_v26 = vld [vmem:[%s1207_s5] ss:$0 sm:$0xff] (!%p222_p2) }
   0xd   : > { %s1210_s22 = smov (!%p254_p3, %s963_s22), 1 }
   0xe   : > { %s969_s25 = sshll.u32 %s1210_s22, 3  ;;  %s1057_s8 = smul.u32 24, %s1210_s22 }
   0xf   : > { %s262_s28 = scalar_lea.vmem %s1203_s1, %s969_s25  ;;  %s266_s24 = scalar_lea.vmem %s1208_s6, %s969_s25 }
  0x10   : > { %v267_v2 = vld [vmem:[%s262_s28] sm:$0xff]  ;;  %s258_s11 = scalar_lea.vmem %s1202_s0, %s1057_s8 }
  0x11   : > { %1005 = vmatmul.mubr.msk.f32.vlgmr.msra.gmra.mrb[0].mxu0 %vm270_vm1, %v267_v2  ;;  %v351_v5 = vld [vmem:[%s258_s11] sm:$0xff]  ;;  %v974_v8 = vld [vmem:[%s258_s11 + $0x8] sm:$0xff]  ;;  %v976_v10 = vld [vmem:[%s258_s11 + $0x10] sm:$0xff] }
  0x12   : > { %1031 = vmatprep.mubr.msk.f32.mxu0 %vm1081_vm0, %v1080_v1 }
  0xe4   : > { %v340_v3 = vpop.f32.mrb[0].mxu0 }
  0xe5   : > { %511 = vrot.lane.b32.xlu1 %v340_v3, %s1082_s29  ;;  %353 = vrot.lane.b32.xlu0 %v340_v3, %s1083_s30  ;;  %v1006_v4 = vpop.f32.mrb[1].mxu0  ;;  %v350_v16 = vadd.f32 %v972_v15, %v340_v3 }
  0xe9   : > { %432 = vrot.lane.b32.xlu0 %v340_v3, %s1084_s7 }
 0x157   : > { %v354_v6 = vpop.permute.xlu0 %353  ;;  %v512_v9 = vpop.permute.xlu1 %511 }
 0x158   : > { %1008 = vmatpush3.msra.mxu1 %v354_v6 }
 0x159   : > { %1010 = vmatmul.mubr.msk.f32.vlgmr.msra.gmra.mrb[0].mxu1 %vm270_vm1, %v351_v5  ;;  %1012 = vmatprep.subr.mxu1 %v1080_v1 }
 0x15a   : > { %1014 = vmatprep.mubr.msk.f32.mxu1 %vm1081_vm0, %v1080_v1 }
 0x15b   : > { %v433_v7 = vpop.permute.xlu0 %432 }
 0x15c   : > { %1013 = vmatpush3.msra.mxu1 %v433_v7 }
 0x15d   : > { %1017 = vmatprep.subr.mxu1 %v1080_v1 }
 0x161   : > { %1015 = vmatmul.mubr.msk.f32.vlgmr.msra.gmra.mrb[0].mxu1 %vm270_vm1, %v974_v8 }
 0x162   : > { %1018 = vmatpush3.msra.mxu1 %v512_v9  ;;  %1019 = vmatprep.mubr.msk.f32.mxu1 %vm1081_vm0, %v1080_v1 }
 0x163   : > { %1044 = vmatprep.subr.bf16.mxu1 %v1085_v14 }
 0x169   : > { %1020 = vmatmul.mubr.msk.f32.vlgmr.msra.gmra.mrb[0].mxu1 %vm270_vm1, %v976_v10 }
 0x16a   : > { %1026 = vmatprep.mubr.msk.f32.mxu1 %vm1081_vm0, %v1080_v1  ;;  %1046 = vmatpush3.bf16.msra.mxu1 %v1045_v13 }
 0x23c   : > { %v583_v17 = vpop.f32.mrb[0].mxu1 }
 0x23d   : > { %v1047_v18 = vadd.f32 %v583_v17, %v350_v16  ;;  %v1021_v19 = vpop.f32.mrb[1].mxu1 }
 0x23f   : > { %v588_v20 = vmax.f32 %v1047_v18, 0.0 }
 0x241   : > { %1027 = vmatmul.mubr.msk.f32.vlgmr.msra.gmra.mrb[2].mxu1 %vm592_vm2, %v588_v20 }
 0x314   : > { %v662_v21 = vpop.f32.mrb[2].mxu1 }
 0x315   : > { %748 = vrot.lane.b32.xlu0 %v662_v21, %s1084_s7  ;;  %674 = vrot.lane.b32.xlu1 %v662_v21, %s1083_s30  ;;  %v1028_v22 = vpop.f32.mrb[3].mxu1  ;;  %v672_v27 = vadd.f32 %v979_v26, %v662_v21 }
 0x319   : > { %822 = vrot.lane.b32.xlu1 %v662_v21, %s1082_s29 }
 0x387   : > { %v675_v23 = vpop.permute.xlu1 %674  ;;  %v749_v24 = vpop.permute.xlu0 %748 }
 0x388   : > { %1030 = vmatpush3.msra.mxu0 %v675_v23 }
 0x389   : > { %1032 = vmatmul.mubr.msk.f32.vlgmr.msra.gmra.mrb[2].mxu0 %vm270_vm1, %v351_v5  ;;  %1034 = vmatprep.subr.mxu0 %v1080_v1 }
 0x38a   : > { %1035 = vmatpush3.msra.mxu0 %v749_v24  ;;  %1036 = vmatprep.mubr.msk.f32.mxu0 %vm1081_vm0, %v1080_v1 }
 0x38b   : > { %1039 = vmatprep.subr.mxu0 %v1080_v1  ;;  %v823_v25 = vpop.permute.xlu1 %822 }
 0x391   : > { %1037 = vmatmul.mubr.msk.f32.vlgmr.msra.gmra.mrb[2].mxu0 %vm270_vm1, %v974_v8 }
 0x392   : > { %1040 = vmatpush3.msra.mxu0 %v823_v25  ;;  %1041 = vmatprep.mubr.msk.f32.mxu0 %vm1081_vm0, %v1080_v1 }
 0x399   : > { %1042 = vmatmul.mubr.msk.f32.vlgmr.msra.gmra.mrb[2].mxu0 %vm270_vm1, %v976_v10 }
 0x46c   : > { %v891_v28 = vpop.f32.mrb[2].mxu0 }
 0x46d   : > { %v1048_v29 = vadd.f32 %v891_v28, %v672_v27  ;;  %v1043_v30 = vpop.f32.mrb[3].mxu0 }
 0x46f   : > { %v896_v31 = vmax.f32 %v1048_v29, 0.0 }
 0x471   : > { %897 = vst.msk [vmem:[%s266_s24] sm:$0xff] %vm592_vm2, %v896_v31 }
 0x472 PF: > { %s16_s21 = sadd.s32 1, %s1078_s21  }
 0x473   : > { %p13_p4 = scmp.ge.s32.totalorder %s16_s21, 4  }
 0x475   :  { %15 = sbr.rel (!%p13_p4) target bundleno = 1 (0x1), region = 79 }

// kernel: _lambda_.4
= control target key start
LH: loop header
LB: loop body
LE: loop exit
PB: predicated region body
PF: predicated region fallthrough
CT: control target
= control target key end

     0   :  { %v900_v0 = vmov 0.0|0.0   ;;  %vm901_vm0 = vmmov 0   ;;  %v902_v6 = vmov 0.0   ;;  %vm33_vm1 = vcmask 130048   ;;  %s903_s28 = smov 96   ;;  %s1041_s1 = inlined_call_operand.vmem [shape: f32[16,48], index: 1, kind: input, shape index: {}]   ;;  %s1042_s2 = inlined_call_operand.vmem [shape: f32[16,48], index: 2, kind: input, shape index: {}]   ;;  %s1043_s0 = inlined_call_operand.vmem [shape: f32[4,2,16], index: 0, kind: input, shape index: {}]   ;;  %s1044_s4 = inlined_call_operand.vmem [shape: f32[1,48], index: 4, kind: input, shape index: {}]   ;;  %s1045_s3 = inlined_call_operand.vmem [shape: f32[1,48], index: 3, kind: input, shape index: {}]   ;;  %s1046_s5 = inlined_call_operand.vmem [shape: f32[2,16], index: 5, kind: output, shape index: {}]  }
   0x1   :  { %846 = vmatprep.subr.bf16.mxu0 %v900_v0  ;;  %849 = vmatprep.subr.bf16.mxu1 %v900_v0  ;;  %v20_v1 = vld [vmem:[%s1041_s1] sm:$0xff]  ;;  %v21_v2 = vld [vmem:[%s1041_s1 + $0x8] sm:$0xff]  ;;  %vm744_vm2 = vcmask 123904  }
   0x2   :  { %v22_v3 = vld [vmem:[%s1042_s2] sm:$0xff]  ;;  %v947_v4 = vpack.c.bf16 %v21_v2, %v20_v1  ;;  %v23_v5 = vld [vmem:[%s1042_s2 + $0x8] sm:$0xff]  ;;  %794 = vmatprep.mubr.msk.f32.mxu0 %vm901_vm0, %v902_v6  ;;  %801 = vmatprep.mubr.msk.f32.mxu1 %vm901_vm0, %v902_v6 }
   0x3   :  { %v956_v7 = vpack.c.bf16 %v23_v5, %v22_v3  ;;  %v26_v8 = vld [vmem:[%s1043_s0] sm:$0x3]  ;;  %v754_v27 = vld [vmem:[%s1043_s0 + $0x2] sm:$0x3]  ;;  %v758_v50 = vld [vmem:[%s1043_s0 + $0x4] sm:$0x3] }
   0x4   :  { %848 = vmatpush3.bf16.msra.mxu0 %v947_v4  ;;  %v978_v9 = vld [vmem:[%s1044_s4] ss:$0 sm:$0xff]  ;;  %s904_s4 = smov 32  }
   0x5   :  { %851 = vmatpush3.bf16.msra.mxu1 %v956_v7  ;;  %852 = vmatprep.subr.bf16.mxu0 %v900_v0  ;;  %v985_v15 = vld [vmem:[%s1045_s3] ss:$0 sm:$0xff]  ;;  %s905_s3 = smov 112  }
   0x6   :  { %855 = vmatprep.subr.bf16.mxu1 %v900_v0 }
   0x7   :  { %795 = vmatmul.mubr.msk.f32.vlgmr.msra.gmra.mrb[0].mxu0 %vm33_vm1, %v26_v8 }
   0x8   :  { %802 = vmatmul.mubr.f32.vlgmr.msra.gmra.mrb[0].mxu1 %v902_v6  ;;  %854 = vmatpush3.bf16.msra.mxu0 %v947_v4 }
   0x9   :  { %857 = vmatpush3.bf16.msra.mxu1 %v956_v7  ;;  %808 = vmatprep.mubr.msk.f32.mxu0 %vm901_vm0, %v902_v6 }
   0xa   :  { %815 = vmatprep.mubr.msk.f32.mxu1 %vm901_vm0, %v902_v6  ;;  %861 = vmatprep.subr.bf16.mxu1 %v900_v0 }
   0xb   :  { %858 = vmatprep.subr.bf16.mxu0 %v900_v0  ;;  %809 = vmatmul.mubr.msk.f32.vlgmr.msra.gmra.mrb[2].mxu0 %vm33_vm1, %v754_v27 }
   0xc   :  { %860 = vmatpush3.bf16.msra.mxu0 %v947_v4  ;;  %822 = vmatprep.mubr.msk.f32.mxu0 %vm901_vm0, %v902_v6 }
   0xd   :  { %864 = vmatprep.subr.bf16.mxu0 %v900_v0 }
   0xf   :  { %823 = vmatmul.mubr.msk.f32.vlgmr.msra.gmra.mrb[4].mxu0 %vm33_vm1, %v758_v50 }
  0x10   :  { %866 = vmatpush3.bf16.msra.mxu0 %v947_v4  ;;  %836 = vmatprep.mubr.msk.f32.mxu0 %vm901_vm0, %v902_v6 }
  0xda   :  { %v103_v10 = vpop.f32.mrb[0].mxu0 }
  0xdb   :  { %v182_v11 = vpop.f32.mrb[0].mxu1  ;;  %v796_v12 = vpop.f32.mrb[1].mxu0  ;;  %v104_v16 = vadd.f32 %v985_v15, %v103_v10  ;;  %v762_v10 = vld [vmem:[%s1043_s0 + $0x6] sm:$0x3] }
  0xdc   :  { %v183_v13 = vadd.f32 %v978_v9, %v182_v11  ;;  %v803_v14 = vpop.f32.mrb[1].mxu1  ;;  %837 = vmatmul.mubr.msk.f32.vlgmr.msra.gmra.mrb[6].mxu0 %vm33_vm1, %v762_v10 }
  0xde   :  { %194 = vrot.lane.b32.xlu0 %v183_v13, %s903_s28  ;;  %v186_v17 = vadd.f32 %v183_v13, %v104_v16  ;;  %v283_v34 = vpop.f32.mrb[2].mxu0 }
  0xdf   :  { %v810_v35 = vpop.f32.mrb[3].mxu0  ;;  %v284_v39 = vadd.f32 %v985_v15, %v283_v34 }
  0xe0   :  { %v753_v18 = vmul.f32 -1.442695, %v186_v17 }
  0xe2   :  { %876 = vpow2.f32 %v753_v18  ;;  %v459_v57 = vpop.f32.mrb[4].mxu0 }
  0xe3   :  { %v824_v58 = vpop.f32.mrb[5].mxu0  ;;  %v460_v62 = vadd.f32 %v985_v15, %v459_v57 }
  0xec   :  { %v877_v19 = vpop.eup %876 }
  0xed   :  { %v190_v20 = vadd.f32 1.0, %v877_v19 }
  0xef   :  { %878 = vrcp.f32 %v190_v20 }
  0xf9   :  { %v879_v21 = vpop.eup %878 }
  0xfa   :  { %v204_v28 = vsub.f32 1.0, %v879_v21  ;;  %v210_v30 = vmul.f32 0.0, %v879_v21 }
 0x150   :  { %v195_v22 = vpop.permute.xlu0 %194 }
 0x151   :  { %v197_v23 = vmul.f32 %v879_v21, %v195_v22 }
 0x153   :  { %199 = vrot.lane.b32.xlu0 %v197_v23, %s904_s4 }
 0x1af   :  { %v635_v18 = vpop.f32.mrb[6].mxu0 }
 0x1b0   :  { %v838_v19 = vpop.f32.mrb[7].mxu0  ;;  %v636_v23 = vadd.f32 %v985_v15, %v635_v18 }
 0x1c5   :  { %v200_v24 = vpop.permute.xlu0 %199 }
 0x1c6   :  { %v202_v25 = vadd.f32 %v200_v24, %v104_v16 }
 0x1c8   :  { %880 = vtanh.f32 %v202_v25 }
 0x1d2   :  { %v881_v26 = vpop.eup %880 }
 0x1d3   :  { %206 = vrot.lane.b32.xlu1 %v881_v26, %s905_s3 }
 0x245   :  { %v207_v29 = vpop.permute.xlu1 %206 }
 0x246   :  { %v209_v31 = vmul.f32 %v207_v29, %v204_v28 }
 0x248   :  { %v211_v32 = vadd.f32 %v210_v30, %v209_v31 }
 0x24a   :  { %288 = vrot.lane.b32.xlu1 %v211_v32, %s905_s3 }
 0x2bc   :  { %v289_v33 = vpop.permute.xlu1 %288 }
 0x2bd   :  { %816 = vmatmul.mubr.msk.f32.vlgmr.msra.gmra.mrb[2].mxu1 %vm33_vm1, %v289_v33 }
 0x2be   :  { %863 = vmatpush3.bf16.msra.mxu1 %v956_v7  ;;  %829 = vmatprep.mubr.msk.f32.mxu1 %vm901_vm0, %v902_v6 }
 0x2bf   :  { %867 = vmatprep.subr.bf16.mxu1 %v900_v0 }
 0x390   :  { %v358_v36 = vpop.f32.mrb[2].mxu1 }
 0x391   :  { %v359_v37 = vadd.f32 %v978_v9, %v358_v36  ;;  %v817_v38 = vpop.f32.mrb[3].mxu1 }
 0x393   :  { %370 = vrot.lane.b32.xlu0 %v359_v37, %s903_s28  ;;  %v362_v40 = vadd.f32 %v359_v37, %v284_v39 }
 0x395   :  { %v757_v41 = vmul.f32 -1.442695, %v362_v40 }
 0x397   :  { %882 = vpow2.f32 %v757_v41 }
 0x3a1   :  { %v883_v42 = vpop.eup %882 }
 0x3a2   :  { %v366_v43 = vadd.f32 1.0, %v883_v42 }
 0x3a4   :  { %884 = vrcp.f32 %v366_v43 }
 0x3ae   :  { %v885_v44 = vpop.eup %884 }
 0x3af   :  { %v380_v51 = vsub.f32 1.0, %v885_v44  ;;  %v386_v53 = vmul.f32 %v885_v44, %v211_v32 }
 0x405   :  { %v371_v45 = vpop.permute.xlu0 %370 }
 0x406   :  { %v373_v46 = vmul.f32 %v885_v44, %v371_v45 }
 0x408   :  { %375 = vrot.lane.b32.xlu1 %v373_v46, %s904_s4 }
 0x47a   :  { %v376_v47 = vpop.permute.xlu1 %375 }
 0x47b   :  { %v378_v48 = vadd.f32 %v376_v47, %v284_v39 }
 0x47d   :  { %886 = vtanh.f32 %v378_v48 }
 0x487   :  { %v887_v49 = vpop.eup %886 }
 0x488   :  { %382 = vrot.lane.b32.xlu0 %v887_v49, %s905_s3 }
 0x4fa   :  { %v383_v52 = vpop.permute.xlu0 %382 }
 0x4fb   :  { %v385_v54 = vmul.f32 %v383_v52, %v380_v51 }
 0x4fd   :  { %v387_v55 = vadd.f32 %v386_v53, %v385_v54 }
 0x4ff   :  { %464 = vrot.lane.b32.xlu1 %v387_v55, %s905_s3 }
 0x571   :  { %v465_v56 = vpop.permute.xlu1 %464 }
 0x572   :  { %830 = vmatmul.mubr.msk.f32.vlgmr.msra.gmra.mrb[4].mxu1 %vm33_vm1, %v465_v56 }
 0x573   :  { %869 = vmatpush3.bf16.msra.mxu1 %v956_v7  ;;  %843 = vmatprep.mubr.msk.f32.mxu1 %vm901_vm0, %v902_v6 }
 0x645   :  { %v534_v59 = vpop.f32.mrb[4].mxu1 }
 0x646   :  { %v535_v60 = vadd.f32 %v978_v9, %v534_v59  ;;  %v831_v61 = vpop.f32.mrb[5].mxu1 }
 0x648   :  { %546 = vrot.lane.b32.xlu0 %v535_v60, %s903_s28  ;;  %v538_v63 = vadd.f32 %v535_v60, %v460_v62 }
 0x64a   :  { %v761_v0 = vmul.f32 -1.442695, %v538_v63 }
 0x64c   :  { %888 = vpow2.f32 %v761_v0 }
 0x656   :  { %v889_v1 = vpop.eup %888 }
 0x657   :  { %v542_v2 = vadd.f32 1.0, %v889_v1 }
 0x659   :  { %890 = vrcp.f32 %v542_v2 }
 0x663   :  { %v891_v3 = vpop.eup %890 }
 0x664   :  { %v556_v11 = vsub.f32 1.0, %v891_v3  ;;  %v562_v13 = vmul.f32 %v891_v3, %v387_v55 }
 0x6ba   :  { %v547_v4 = vpop.permute.xlu0 %546 }
 0x6bb   :  { %v549_v5 = vmul.f32 %v891_v3, %v547_v4 }
 0x6bd   :  { %551 = vrot.lane.b32.xlu1 %v549_v5, %s904_s4 }
 0x72f   :  { %v552_v6 = vpop.permute.xlu1 %551 }
 0x730   :  { %v554_v7 = vadd.f32 %v552_v6, %v460_v62 }
 0x732   :  { %892 = vtanh.f32 %v554_v7 }
 0x73c   :  { %v893_v8 = vpop.eup %892 }
 0x73d   :  { %558 = vrot.lane.b32.xlu0 %v893_v8, %s905_s3 }
 0x7af   :  { %v559_v12 = vpop.permute.xlu0 %558 }
 0x7b0   :  { %v561_v14 = vmul.f32 %v559_v12, %v556_v11 }
 0x7b2   :  { %v563_v16 = vadd.f32 %v562_v13, %v561_v14 }
 0x7b4   :  { %640 = vrot.lane.b32.xlu1 %v563_v16, %s905_s3 }
 0x826   :  { %v641_v17 = vpop.permute.xlu1 %640 }
 0x827   :  { %844 = vmatmul.mubr.msk.f32.vlgmr.msra.gmra.mrb[6].mxu1 %vm33_vm1, %v641_v17 }
 0x8fa   :  { %v710_v20 = vpop.f32.mrb[6].mxu1 }
 0x8fb   :  { %v711_v21 = vadd.f32 %v978_v9, %v710_v20  ;;  %v845_v22 = vpop.f32.mrb[7].mxu1 }
 0x8fd   :  { %722 = vrot.lane.b32.xlu0 %v711_v21, %s903_s28  ;;  %v714_v24 = vadd.f32 %v711_v21, %v636_v23 }
 0x8ff   :  { %v765_v25 = vmul.f32 -1.442695, %v714_v24 }
 0x901   :  { %894 = vpow2.f32 %v765_v25 }
 0x90b   :  { %v895_v26 = vpop.eup %894 }
 0x90c   :  { %v718_v27 = vadd.f32 1.0, %v895_v26 }
 0x90e   :  { %896 = vrcp.f32 %v718_v27 }
 0x918   :  { %v897_v28 = vpop.eup %896 }
 0x919   :  { %v732_v33 = vsub.f32 1.0, %v897_v28  ;;  %v738_v15 = vmul.f32 %v897_v28, %v563_v16 }
 0x96f   :  { %v723_v29 = vpop.permute.xlu0 %722 }
 0x970   :  { %v725_v30 = vmul.f32 %v897_v28, %v723_v29 }
 0x972   :  { %727 = vrot.lane.b32.xlu1 %v725_v30, %s904_s4 }
 0x9e4   :  { %v728_v31 = vpop.permute.xlu1 %727 }
 0x9e5   :  { %v730_v32 = vadd.f32 %v728_v31, %v636_v23 }
 0x9e7   :  { %898 = vtanh.f32 %v730_v32 }
 0x9f1   :  { %v899_v9 = vpop.eup %898 }
 0x9f2   :  { %734 = vrot.lane.b32.xlu0 %v899_v9, %s905_s3 }
 0xa64   :  { %v735_v34 = vpop.permute.xlu0 %734 }
 0xa65   :  { %v737_v35 = vmul.f32 %v735_v34, %v732_v33 }
 0xa67   :  { %v739_v36 = vadd.f32 %v738_v15, %v737_v35 }
 0xa69   :  { %741 = vrot.lane.b32.xlu1 %v739_v36, %s905_s3 }
 0xadb   :  { %v742_v37 = vpop.permute.xlu1 %741 }
 0xadc   :  { %745 = vst.msk [vmem:[%s1046_s5] sm:$0x3] %vm744_vm2, %v742_v37 }

// kernel: _lambda_.3
= control target key start
LH: loop header
LB: loop body
LE: loop exit
PB: predicated region body
PF: predicated region fallthrough
CT: control target
= control target key end

     0   :  { %s1779_s24 = smov 0   ;;  %s1953_s0 = inlined_call_operand.vmem [shape: f32[2,3,32,32], index: 0, kind: input, shape index: {}]   ;;  %s1954_s1 = inlined_call_operand.vmem [shape: f32[2,32,8], index: 1, kind: input, shape index: {}]   ;;  %s1955_s2 = inlined_call_operand.vmem [shape: f32[8,64], index: 2, kind: input, shape index: {}]   ;;  %s1956_s3 = inlined_call_operand.vmem [shape: f32[1,16], index: 3, kind: input, shape index: {}]   ;;  %s1957_s4 = inlined_call_operand.vmem [shape: f32[16,64], index: 4, kind: input, shape index: {}]   ;;  %s1958_s5 = inlined_call_operand.vmem [shape: f32[1,16], index: 5, kind: input, shape index: {}]   ;;  %s1959_s6 = inlined_call_operand.vmem [shape: f32[4,32], index: 6, kind: input, shape index: {}]   ;;  %s1960_s7 = inlined_call_operand.vmem [shape: f32[2,4,16], index: 7, kind: output, shape index: {}]  }
   0x1 LB: > { %s1336_s25 = sadd.s32 4294967295, %s1731_s24   ;;  %p1340_p0 = scmp.ge.s32.totalorder %s1731_s24, 1  ;;  %s1731_s24 = sphi %s1779_s24, %s17_s24  }
   0x2   : > { %p247_p1 = scmp.lt.s32.totalorder %s1731_s24, 3 }
   0x4   : > { %p248_p2 = pnand %p1340_p0, %p247_p1 }
   0x5   : > { %v301_v0 = vld [vmem:[%s1955_s2] sm:$0xff] (!%p248_p2)  ;;  %p283_p3 = scmp.lt.s32.totalorder (!%p248_p2), %s1336_s25, 1  ;;  %vm303_vm0 = vcmask (!%p248_p2), 64512   ;;  %vm431_vm1 = vcmask (!%p248_p2), 261120   ;;  %s1733_s13 = smov (!%p248_p2), 96   ;;  %v774_v48 = vld [vmem:[%s1957_s4 + $0x8] sm:$0xff] (!%p248_p2) }
   0x6   : > { %251 = sbr.rel (%p248_p2) target bundleno = 1391 (0x56f), region = 48  ;;  %1455 = vmatprep.subr.mxu1 (!%p248_p2), %v301_v0  ;;  %s1734_s14 = smov (!%p248_p2), 112   ;;  %v773_v47 = vld [vmem:[%s1957_s4] sm:$0xff] (!%p248_p2)  ;;  %vm776_vm2 = vcmask (!%p248_p2), 130048   ;;  %vm1737_vm3 = vmmov (!%p248_p2), 0   ;;  %vm1269_vm4 = vcmask (!%p248_p2), 125952  }
   0x7   : > { %1456 = vmatpush3.msra.mxu1 (!%p248_p2), %v301_v0  ;;  %s1735_s15 = smov (!%p248_p2), 80   ;;  %v1592_v49 = vpack.c.bf16 (!%p248_p2), %v774_v48, %v773_v47  ;;  %v1349_v50 = vld [vmem:[%s1956_s3] ss:$0 sm:$0xff] (!%p248_p2) }
   0x9   : > { %1593 = vmatprep.subr.bf16.mxu0 (!%p248_p2), %v1592_v49 }
   0xa   : > { %1595 = vmatpush3.bf16.msra.mxu0 (!%p248_p2), %v1592_v49 }
   0xd   : > { %s1962_s25 = smov (!%p283_p3, %s1336_s25), 1 }
   0xe   : > { %s1390_s28 = sshll.u32 %s1962_s25, 5  ;;  %s1650_s9 = smul.u32 96, %s1962_s25 }
   0xf   : > { %s292_s8 = scalar_lea.vmem %s1954_s1, %s1390_s28  ;;  %s1344_s28 = sshll.u32 %s1962_s25, 2 }
  0x10   : > { %v297_v1 = vld [vmem:[%s292_s8] sm:$0xff]  ;;  %v298_v2 = vld [vmem:[%s292_s8 + $0x8] sm:$0xff]  ;;  %v299_v3 = vld [vmem:[%s292_s8 + $0x10] sm:$0xff]  ;;  %s1800_s12 = scalar_lea.vmem %s1953_s0, %s1650_s9 }
  0x11   : > { %1457 = vmatprep.mubr.msk.f32.mxu1 %vm303_vm0, %v297_v1  ;;  %v300_v4 = vld [vmem:[%s292_s8 + $0x18] sm:$0xff]  ;;  %v1807_v7 = vld [vmem:[%s1800_s12] sm:$0xff]  ;;  %v1826_v28 = vld [vmem:[%s1800_s12 + $0x8] sm:$0xff]  ;;  %s296_s8 = scalar_lea.vmem %s1960_s7, %s1344_s28 }
  0x12   : > { %1458 = vmatmul.mubr.msk.f32.vlgmr.msra.gmra.mrb[0].mxu1 %vm303_vm0, %v298_v2  ;;  %v1829_v29 = vld [vmem:[%s1800_s12 + $0x10] sm:$0xff]  ;;  %v1836_v34 = vld [vmem:[%s1800_s12 + $0x18] sm:$0xff]  ;;  %v1839_v35 = vld [vmem:[%s1800_s12 + $0x20] sm:$0xff] }
  0x13   : > { %1460 = vmatprep.mubr.msk.f32.mxu1 %vm303_vm0, %v299_v3  ;;  %v1846_v39 = vld [vmem:[%s1800_s12 + $0x28] sm:$0xff]  ;;  %v1849_v40 = vld [vmem:[%s1800_s12 + $0x30] sm:$0xff]  ;;  %v1856_v42 = vld [vmem:[%s1800_s12 + $0x38] sm:$0xff] }
  0x14   : > { %v1859_v43 = vld [vmem:[%s1800_s12 + $0x40] sm:$0xff]  ;;  %v1866_v44 = vld [vmem:[%s1800_s12 + $0x48] sm:$0xff]  ;;  %v1869_v45 = vld [vmem:[%s1800_s12 + $0x50] sm:$0xff] }
  0x15   : > { %v1876_v46 = vld [vmem:[%s1800_s12 + $0x58] sm:$0xff] }
  0x16   : > { %1461 = vmatmul.mubr.msk.f32.gmra.mrb[2].mxu1 %vm303_vm0, %v300_v4 }
  0x17   : > { %1471 = vmatprep.mubr.msk.f32.mxu1 %vm431_vm1, %v1807_v7 }
  0xe5   : > { %v1802_v5 = vpop.f32.mrb[0].mxu1 }
  0xe6   : > { %v1804_v6 = vpop.f32.mrb[1].mxu1  ;;  %v408_v51 = vadd.f32 %v1802_v5, %v1349_v50 }
  0xe7   : > { %v1675_v8 = vpack.i.bf16 %v1802_v5, %v1804_v6  ;;  %v407_v53 = vadd.f32 %v1349_v50, %v1804_v6 }
  0xe9   : > { %1676 = vrot.lane.b32.xlu1 %v1675_v8, %s1733_s13  ;;  %1666 = vrot.lane.b32.xlu0 %v1675_v8, %s1734_s14  ;;  %v1815_v9 = vpop.f32.mrb[2].mxu1 }
  0xea   : > { %v1817_v10 = vpop.f32.mrb[3].mxu1  ;;  %v410_v57 = vadd.f32 %v1815_v9, %v1349_v50 }
  0xeb   : > { %v1680_v11 = vpack.i.bf16 %v1815_v9, %v1817_v10  ;;  %v409_v60 = vadd.f32 %v1349_v50, %v1817_v10 }
  0xed   : > { %1681 = vrot.lane.b32.xlu1 %v1680_v11, %s1733_s13  ;;  %1671 = vrot.lane.b32.xlu0 %v1680_v11, %s1734_s14 }
  0xf1   : > { %1691 = vrot.lane.b32.xlu1 %v1680_v11, %s1735_s15  ;;  %1686 = vrot.lane.b32.xlu0 %v1675_v8, %s1735_s15 }
 0x15b   : > { %v1677_v12 = vpop.permute.xlu1 %1676  ;;  %v1667_v13 = vpop.permute.xlu0 %1666 }
 0x15c   : > { %v1669_v14 = vunpack.i.h.bf16 %v1667_v13  ;;  %v1668_v15 = vunpack.i.l.bf16 %v1667_v13  ;;  %v1679_v18 = vunpack.i.h.bf16 %v1677_v12  ;;  %v1678_v19 = vunpack.i.l.bf16 %v1677_v12 }
 0x15e   : > { %v1568_v16 = vpack.c.bf16 %v1669_v14, %v1668_v15  ;;  %v1576_v24 = vpack.c.bf16 %v1679_v18, %v1678_v19 }
 0x15f   : > { %v1672_v17 = vpop.permute.xlu0 %1671  ;;  %v1682_v22 = vpop.permute.xlu1 %1681 }
 0x160   : > { %v1674_v20 = vunpack.i.h.bf16 %v1672_v17  ;;  %v1673_v21 = vunpack.i.l.bf16 %v1672_v17  ;;  %1569 = vmatprep.subr.bf16.mxu1 %v1568_v16  ;;  %v1684_v25 = vunpack.i.h.bf16 %v1682_v22  ;;  %v1683_v26 = vunpack.i.l.bf16 %v1682_v22 }
 0x161   : > { %1571 = vmatpush3.bf16.msra.mxu1 %v1568_v16 }
 0x162   : > { %v1572_v23 = vpack.c.bf16 %v1674_v20, %v1673_v21  ;;  %v1580_v30 = vpack.c.bf16 %v1684_v25, %v1683_v26 }
 0x163   : > { %v1687_v27 = vpop.permute.xlu0 %1686  ;;  %v1692_v33 = vpop.permute.xlu1 %1691 }
 0x164   : > { %1573 = vmatprep.subr.bf16.mxu1 %v1572_v23  ;;  %v1689_v31 = vunpack.i.h.bf16 %v1687_v27  ;;  %v1688_v32 = vunpack.i.l.bf16 %v1687_v27  ;;  %v1694_v36 = vunpack.i.h.bf16 %v1692_v33  ;;  %v1693_v37 = vunpack.i.l.bf16 %v1692_v33 }
 0x165   : > { %1575 = vmatpush3.bf16.msra.mxu1 %v1572_v23 }
 0x166   : > { %1577 = vmatprep.subr.bf16.mxu1 %v1576_v24  ;;  %v1584_v38 = vpack.c.bf16 %v1689_v31, %v1688_v32  ;;  %v1588_v41 = vpack.c.bf16 %v1694_v36, %v1693_v37 }
 0x168   : > { %1472 = vmatmul.mubr.msk.f32.vlgmr.msra.gmra.mrb[4].mxu1 %vm431_vm1, %v1826_v28 }
 0x169   : > { %1579 = vmatpush3.bf16.msra.mxu1 %v1576_v24  ;;  %1474 = vmatprep.mubr.msk.f32.mxu1 %vm431_vm1, %v1829_v29 }
 0x16a   : > { %1581 = vmatprep.subr.bf16.mxu1 %v1580_v30 }
 0x16c   : > { %1475 = vmatmul.mubr.msk.f32.gmra.mrb[6].mxu1 %vm431_vm1, %v1836_v34 }
 0x16d   : > { %1583 = vmatpush3.bf16.msra.mxu1 %v1580_v30  ;;  %1485 = vmatprep.mubr.msk.f32.mxu1 %vm431_vm1, %v1839_v35 }
 0x16e   : > { %1585 = vmatprep.subr.bf16.mxu1 %v1584_v38 }
 0x170   : > { %1486 = vmatmul.mubr.msk.f32.vlgmr.msra.gmra.mrb[4].mxu1 %vm431_vm1, %v1846_v39 }
 0x171   : > { %1587 = vmatpush3.bf16.msra.mxu1 %v1584_v38  ;;  %1488 = vmatprep.mubr.msk.f32.mxu1 %vm431_vm1, %v1849_v40 }
 0x172   : > { %1589 = vmatprep.subr.bf16.mxu1 %v1588_v41 }
 0x174   : > { %1489 = vmatmul.mubr.msk.f32.gmra.mrb[6].mxu1 %vm431_vm1, %v1856_v42 }
 0x175   : > { %1591 = vmatpush3.bf16.msra.mxu1 %v1588_v41  ;;  %1499 = vmatprep.mubr.msk.f32.mxu1 %vm431_vm1, %v1859_v43 }
 0x178   : > { %1500 = vmatmul.mubr.msk.f32.vlgmr.msra.gmra.mrb[4].mxu1 %vm431_vm1, %v1866_v44 }
 0x179   : > { %1502 = vmatprep.mubr.msk.f32.mxu1 %vm431_vm1, %v1869_v45 }
 0x17c   : > { %1503 = vmatmul.mubr.msk.f32.gmra.mrb[6].mxu1 %vm431_vm1, %v1876_v46 }
 0x24b   : > { %v1501_v52 = vpop.f32.mrb[4].mxu1 }
 0x24c   : > { %v1626_v54 = vadd.f32 %v1501_v52, %v408_v51  ;;  %v746_v55 = vpop.f32.mrb[5].mxu1 }
 0x24d   : > { %v1627_v56 = vadd.f32 %v746_v55, %v407_v53 }
 0x24e   : > { %v770_v61 = vmax.f32 %v1626_v54, 0.0  ;;  %v1195_v54 = vld [vmem:[%s1959_s6] sm:$0xf] }
 0x24f   : > { %v769_v58 = vmax.f32 %v1627_v56, 0.0  ;;  %v1504_v59 = vpop.f32.mrb[6].mxu1 }
 0x250   : > { %v1628_v62 = vadd.f32 %v1504_v59, %v410_v57  ;;  %v756_v63 = vpop.f32.mrb[7].mxu1 }
 0x251   : > { %v1629_v0 = vadd.f32 %v756_v63, %v409_v60  ;;  %1509 = vmatprep.mubr.msk.f32.mxu0 %vm776_vm2, %v769_v58 }
 0x252   : > { %1510 = vmatmul.mubr.msk.f32.vlgmr.msra.gmra.mrb[0].mxu0 %vm776_vm2, %v770_v61  ;;  %v772_v2 = vmax.f32 %v1628_v62, 0.0 }
 0x253   : > { %v771_v1 = vmax.f32 %v1629_v0, 0.0 }
 0x255   : > { %1512 = vmatprep.mubr.msk.f32.mxu0 %vm776_vm2, %v771_v1 }
 0x256   : > { %1513 = vmatmul.mubr.msk.f32.gmra.mrb[2].mxu0 %vm776_vm2, %v772_v2 }
 0x257   : > { %1523 = vmatprep.mubr.msk.f32.mxu0 %vm431_vm1, %v1807_v7 }
 0x325   : > { %v1895_v3 = vpop.f32.mrb[0].mxu0 }
 0x326   : > { %v1897_v4 = vpop.f32.mrb[1].mxu0 }
 0x327   : > { %v1695_v5 = vpack.i.bf16 %v1895_v3, %v1897_v4 }
 0x329   : > { %1696 = vrot.lane.b32.xlu0 %v1695_v5, %s1734_s14  ;;  %v1902_v6 = vpop.f32.mrb[2].mxu0 }
 0x32a   : > { %v1904_v8 = vpop.f32.mrb[3].mxu0 }
 0x32b   : > { %v1700_v9 = vpack.i.bf16 %v1902_v6, %v1904_v8 }
 0x32d   : > { %1706 = vrot.lane.b32.xlu0 %v1695_v5, %s1733_s13  ;;  %1701 = vrot.lane.b32.xlu1 %v1700_v9, %s1734_s14 }
 0x331   : > { %1716 = vrot.lane.b32.xlu0 %v1695_v5, %s1735_s15  ;;  %1711 = vrot.lane.b32.xlu1 %v1700_v9, %s1733_s13 }
 0x335   : > { %1721 = vrot.lane.b32.xlu1 %v1700_v9, %s1735_s15 }
 0x39b   : > { %v1697_v7 = vpop.permute.xlu0 %1696 }
 0x39c   : > { %v1699_v10 = vunpack.i.h.bf16 %v1697_v7  ;;  %v1698_v11 = vunpack.i.l.bf16 %v1697_v7 }
 0x39e   : > { %v1596_v12 = vpack.c.bf16 %v1699_v10, %v1698_v11 }
 0x39f   : > { %v1707_v13 = vpop.permute.xlu0 %1706  ;;  %v1702_v14 = vpop.permute.xlu1 %1701 }
 0x3a0   : > { %v1709_v15 = vunpack.i.h.bf16 %v1707_v13  ;;  %v1708_v16 = vunpack.i.l.bf16 %v1707_v13  ;;  %v1704_v17 = vunpack.i.h.bf16 %v1702_v14  ;;  %v1703_v18 = vunpack.i.l.bf16 %v1702_v14  ;;  %1597 = vmatprep.subr.bf16.mxu0 %v1596_v12 }
 0x3a1   : > { %1599 = vmatpush3.bf16.msra.mxu0 %v1596_v12 }
 0x3a2   : > { %v1600_v19 = vpack.c.bf16 %v1704_v17, %v1703_v18  ;;  %v1604_v21 = vpack.c.bf16 %v1709_v15, %v1708_v16 }
 0x3a3   : > { %v1712_v20 = vpop.permute.xlu1 %1711  ;;  %v1717_v24 = vpop.permute.xlu0 %1716 }
 0x3a4   : > { %v1714_v22 = vunpack.i.h.bf16 %v1712_v20  ;;  %v1713_v23 = vunpack.i.l.bf16 %v1712_v20  ;;  %1601 = vmatprep.subr.bf16.mxu0 %v1600_v19  ;;  %v1719_v25 = vunpack.i.h.bf16 %v1717_v24  ;;  %v1718_v26 = vunpack.i.l.bf16 %v1717_v24 }
 0x3a5   : > { %1603 = vmatpush3.bf16.msra.mxu0 %v1600_v19 }
 0x3a6   : > { %1605 = vmatprep.subr.bf16.mxu0 %v1604_v21  ;;  %v1608_v27 = vpack.c.bf16 %v1714_v22, %v1713_v23  ;;  %v1612_v31 = vpack.c.bf16 %v1719_v25, %v1718_v26 }
 0x3a7   : > { %v1722_v30 = vpop.permute.xlu1 %1721 }
 0x3a8   : > { %1524 = vmatmul.mubr.msk.f32.vlgmr.msra.gmra.mrb[4].mxu0 %vm431_vm1, %v1826_v28  ;;  %v1724_v32 = vunpack.i.h.bf16 %v1722_v30  ;;  %v1723_v33 = vunpack.i.l.bf16 %v1722_v30  ;;  %v1736_v28 = vmov 0.0|0.0  }
 0x3a9   : > { %1607 = vmatpush3.bf16.msra.mxu0 %v1604_v21  ;;  %1526 = vmatprep.mubr.msk.f32.mxu0 %vm431_vm1, %v1829_v29  ;;  %v1738_v29 = vmov 0.0  }
 0x3aa   : > { %1609 = vmatprep.subr.bf16.mxu0 %v1608_v27  ;;  %v1616_v36 = vpack.c.bf16 %v1724_v32, %v1723_v33  ;;  %1620 = vmatprep.subr.bf16.mxu1 %v1736_v28 }
 0x3ab   : > { %1565 = vmatprep.mubr.msk.f32.mxu1 %vm1737_vm3, %v1738_v29 }
 0x3ac   : > { %1527 = vmatmul.mubr.msk.f32.gmra.mrb[6].mxu0 %vm431_vm1, %v1836_v34  ;;  %v1374_v34 = vld [vmem:[%s1958_s5] ss:$0 sm:$0xff] }
 0x3ad   : > { %1611 = vmatpush3.bf16.msra.mxu0 %v1608_v27  ;;  %1537 = vmatprep.mubr.msk.f32.mxu0 %vm431_vm1, %v1839_v35  ;;  %v881_v35 = vadd.f32 %v1895_v3, %v1374_v34  ;;  %v880_v38 = vadd.f32 %v1374_v34, %v1897_v4 }
 0x3ae   : > { %1613 = vmatprep.subr.bf16.mxu0 %v1612_v31 }
 0x3b0   : > { %1538 = vmatmul.mubr.msk.f32.vlgmr.msra.gmra.mrb[4].mxu0 %vm431_vm1, %v1846_v39 }
 0x3b1   : > { %1615 = vmatpush3.bf16.msra.mxu0 %v1612_v31  ;;  %1540 = vmatprep.mubr.msk.f32.mxu0 %vm431_vm1, %v1849_v40 }
 0x3b2   : > { %1617 = vmatprep.subr.bf16.mxu0 %v1616_v36 }
 0x3b4   : > { %1541 = vmatmul.mubr.msk.f32.gmra.mrb[6].mxu0 %vm431_vm1, %v1856_v42 }
 0x3b5   : > { %1619 = vmatpush3.bf16.msra.mxu0 %v1616_v36  ;;  %1551 = vmatprep.mubr.msk.f32.mxu0 %vm431_vm1, %v1859_v43  ;;  %v883_v43 = vadd.f32 %v1902_v6, %v1374_v34 }
 0x3b8   : > { %1552 = vmatmul.mubr.msk.f32.vlgmr.msra.gmra.mrb[4].mxu0 %vm431_vm1, %v1866_v44 }
 0x3b9   : > { %1554 = vmatprep.mubr.msk.f32.mxu0 %vm431_vm1, %v1869_v45 }
 0x3bc   : > { %1555 = vmatmul.mubr.msk.f32.gmra.mrb[6].mxu0 %vm431_vm1, %v1876_v46  ;;  %v882_v46 = vadd.f32 %v1374_v34, %v1904_v8 }
 0x48b   : > { %v1553_v37 = vpop.f32.mrb[4].mxu0 }
 0x48c   : > { %v1630_v39 = vadd.f32 %v1553_v37, %v881_v35  ;;  %v1168_v40 = vpop.f32.mrb[5].mxu0 }
 0x48d   : > { %v1631_v41 = vadd.f32 %v1168_v40, %v880_v38 }
 0x48e   : > { %v1192_v42 = vmax.f32 %v1630_v39, 0.0 }
 0x48f   : > { %v1191_v44 = vmax.f32 %v1631_v41, 0.0  ;;  %v1556_v45 = vpop.f32.mrb[6].mxu0 }
 0x490   : > { %v1632_v47 = vadd.f32 %v1556_v45, %v883_v43  ;;  %v1178_v48 = vpop.f32.mrb[7].mxu0 }
 0x491   : > { %v1621_v49 = vpack.c.bf16 %v1192_v42, %v1191_v44  ;;  %v1633_v50 = vadd.f32 %v1178_v48, %v882_v46 }
 0x492   : > { %v1194_v51 = vmax.f32 %v1632_v47, 0.0 }
 0x493   : > { %v1193_v52 = vmax.f32 %v1633_v50, 0.0  ;;  %1622 = vmatpush3.bf16.msra.mxu1 %v1621_v49 }
 0x494   : > { %1623 = vmatprep.subr.bf16.mxu1 %v1736_v28 }
 0x495   : > { %v1624_v53 = vpack.c.bf16 %v1194_v51, %v1193_v52 }
 0x497   : > { %1625 = vmatpush3.bf16.msra.mxu1 %v1624_v53 }
 0x49a   : > { %1566 = vmatmul.mubr.msk.f32.vlgmr.msra.gmra.mrb[8].mxu1 %vm431_vm1, %v1195_v54 }
 0x56d   : > { %v1265_v55 = vpop.f32.mrb[8].mxu1 }
 0x56e   : > { %1270 = vst.msk [vmem:[%s296_s8] sm:$0xf] %vm1269_vm4, %v1265_v55  ;;  %v1567_v56 = vpop.f32.mrb[9].mxu1 }
 0x56f PF: > { %s17_s24 = sadd.s32 1, %s1731_s24  }
 0x570   : > { %p14_p4 = scmp.ge.s32.totalorder %s17_s24, 4  }
 0x572   :  { %16 = sbr.rel (!%p14_p4) target bundleno = 1 (0x1), region = 83 }

</bundles_post_ra>
